<compile_context>
chip_gen: v7x
topology: tpu7x:2x2x1
jax: 0.10.0
libtpu: 0.0.40
codegen_flags: <defaults>
</compile_context>

<pallas_src>
import jax
import jax.numpy as jnp
from jax.experimental import pallas as pl
from jax.experimental.pallas import tpu as pltpu

D_MODEL = 128
S_EA = 64
H1 = 512
H2 = 1024


def encoder_kernel(x_ref, wmk_ref, wmv_ref, w1_ref, w2_ref, o_ref):
    bb, n, d = x_ref.shape
    # Collapse (block_b, N, 128) -> (block_b*N, 128). N is a multiple of 8 in
    # practice so this is a free (tile-aligned) view, and it gives the MXU a
    # fat M dimension for all four matmuls.
    x = x_ref[...].reshape(bb * n, d)

    # --- ExternalAttention (f32 operands, tiny FLOPs) ---
    attn = jnp.dot(x, wmk_ref[...], preferred_element_type=jnp.float32)  # (R, S)
    a3 = attn.reshape(bb, n, S_EA)  # per-batch view for the reductions
    # softmax over torch dim=1 (the sequence axis N), per batch element
    m = jnp.max(a3, axis=1, keepdims=True)
    e = jnp.exp(a3 - m)
    a3 = e * pl.reciprocal(jnp.sum(e, axis=1, keepdims=True), approx=True)
    # renormalize over the S axis (torch dim=2)
    a3 = a3 * pl.reciprocal(jnp.sum(a3, axis=2, keepdims=True), approx=True)
    attn = a3.reshape(bb * n, S_EA)
    ea = jnp.dot(attn, wmv_ref[...], preferred_element_type=jnp.float32)  # (R, 128)

    # --- residual + MLP (bf16 operands, f32 accumulation) ---
    h = x + ea
    h1 = jnp.dot(h.astype(jnp.bfloat16), w1_ref[...],
                 preferred_element_type=jnp.float32)                      # (R, 512)
    h1 = jnp.where(h1 >= 0.0, h1, 0.2 * h1)                               # LeakyReLU(0.2)
    y = jnp.dot(h1.astype(jnp.bfloat16), w2_ref[...],
                preferred_element_type=jnp.float32)                       # (R, 1024)

    o_ref[...] = y.reshape(bb, n, H2)


def encoder_forward(x, wmk_t, wmv_t, w1_t, w2_t, *, target_rows=512):
    B, N, D = x.shape
    assert D == D_MODEL

    # Choose block_b so that block_b * N ~ target_rows and block_b divides B.
    block_b = max(1, min(B, max(1, target_rows // max(N, 1))))
    while B % block_b != 0:
        block_b -= 1
    grid = (B // block_b,)

    # Pre-cast the heavy MLP weights to bf16 once (f32 accumulation in-kernel).
    w1_bf16 = w1_t.astype(jnp.bfloat16)
    w2_bf16 = w2_t.astype(jnp.bfloat16)

    flops = 2 * B * N * (D_MODEL * S_EA + S_EA * D_MODEL + D_MODEL * H1 + H1 * H2)
    bytes_accessed = (x.size * 4 + wmk_t.size * 4 + wmv_t.size * 4
                      + w1_bf16.size * 2 + w2_bf16.size * 2 + B * N * H2 * 4)

    in_specs = [
        pl.BlockSpec((block_b, N, D_MODEL), lambda b: (b, 0, 0)),
        # Weights: constant index_map -> resident in VMEM, never re-DMA'd.
        pl.BlockSpec((D_MODEL, S_EA), lambda b: (0, 0)),
        pl.BlockSpec((S_EA, D_MODEL), lambda b: (0, 0)),
        pl.BlockSpec((D_MODEL, H1), lambda b: (0, 0)),
        pl.BlockSpec((H1, H2), lambda b: (0, 0)),
    ]
    out_specs = pl.BlockSpec((block_b, N, H2), lambda b: (b, 0, 0))

    return pl.pallas_call(
        encoder_kernel,
        out_shape=jax.ShapeDtypeStruct((B, N, H2), jnp.float32),
        grid_spec=pltpu.PrefetchScalarGridSpec(
            num_scalar_prefetch=0,
            grid=grid,
            in_specs=in_specs,
            out_specs=out_specs,
        ),
        compiler_params=pltpu.CompilerParams(
            dimension_semantics=("parallel",),
        ),
        cost_estimate=pl.CostEstimate(
            flops=flops,
            transcendentals=B * N * S_EA,
            bytes_accessed=bytes_accessed,
        ),
    )(x, wmk_t, wmv_t, w1_bf16, w2_bf16)


def encoder_reference(x, wmk_t, wmv_t, w1_t, w2_t):
    attn = jnp.einsum("bnd,ds->bns", x, wmk_t)
    attn = jax.nn.softmax(attn, axis=1)                       # softmax over N
    attn = attn / jnp.sum(attn, axis=2, keepdims=True)        # normalize over S
    ea = jnp.einsum("bns,sd->bnd", attn, wmv_t)
    h = x + ea
    h1 = jnp.einsum("bnd,dh->bnh", h, w1_t)
    h1 = jnp.where(h1 >= 0.0, h1, 0.2 * h1)
    return jnp.einsum("bnh,ho->bno", h1, w2_t)


if __name__ == "__main__":
    key = jax.random.PRNGKey(0)
    k_x, k_mk, k_mv, k_w1, k_w2 = jax.random.split(key, 5)

    B, N = 2, 8  # small shapes: batch=2, seq=8, d_model=128
    x = jax.random.normal(k_x, (B, N, D_MODEL), dtype=jnp.float32)

    # Deterministic synthetic weights (pre-transposed to (in, out) layout).
    wmk_t = jax.random.normal(k_mk, (D_MODEL, S_EA), dtype=jnp.float32) * 0.05
    wmv_t = jax.random.normal(k_mv, (S_EA, D_MODEL), dtype=jnp.float32) * 0.05
    w1_t = jax.random.normal(k_w1, (D_MODEL, H1), dtype=jnp.float32) * 0.05
    w2_t = jax.random.normal(k_w2, (H1, H2), dtype=jnp.float32) * 0.05

    out = encoder_forward(x, wmk_t, wmv_t, w1_t, w2_t)
    out = jax.block_until_ready(out)

    ref = encoder_reference(x, wmk_t, wmv_t, w1_t, w2_t)
    assert out.shape == (B, N, H2)
    # MLP matmuls use bf16 operands (f32 accumulation) -> loosened tolerance
    # vs. the pure-f32 reference; this is expected quantization error.
    assert jnp.allclose(out, ref, atol=5e-2, rtol=5e-2), "mismatch vs reference"

    print("KERNEL_OK")
</pallas_src>

<mosaic_0001>
module attributes {stable_mosaic.version = 11 : i64} {
  func.func @encoder_kernel(%arg0: i32, %arg1: memref<2x8x128xf32, #tpu.memory_space<vmem>>, %arg2: memref<128x64xf32, #tpu.memory_space<vmem>>, %arg3: memref<64x128xf32, #tpu.memory_space<vmem>>, %arg4: memref<128x512xbf16, #tpu.memory_space<vmem>>, %arg5: memref<512x1024xbf16, #tpu.memory_space<vmem>>, %arg6: memref<2x8x1024xf32, #tpu.memory_space<vmem>>) attributes {dimension_semantics = [#tpu.dimension_semantics<parallel>], iteration_bounds = array<i64: 1>, scalar_prefetch = 0 : i64, scratch_operands = 0 : i64, tpu.core_type = #tpu.core_type<tc>, window_params = [{transform_indices = @transform_0, window_bounds = array<i64: 2, 8, 128>}, {pipeline_mode = #tpu.pipeline_mode<synchronous>, transform_indices = @transform_1, window_bounds = array<i64: 128, 64>}, {pipeline_mode = #tpu.pipeline_mode<synchronous>, transform_indices = @transform_2, window_bounds = array<i64: 64, 128>}, {pipeline_mode = #tpu.pipeline_mode<synchronous>, transform_indices = @transform_3, window_bounds = array<i64: 128, 512>}, {pipeline_mode = #tpu.pipeline_mode<synchronous>, transform_indices = @transform_4, window_bounds = array<i64: 512, 1024>}, {transform_indices = @transform_5, window_bounds = array<i64: 2, 8, 1024>}]} {
    %c0 = arith.constant 0 : index
    %c0_0 = arith.constant 0 : index
    %c0_1 = arith.constant 0 : index
    %0 = vector.load %arg1[%c0, %c0_0, %c0_1] : memref<2x8x128xf32, #tpu.memory_space<vmem>>, vector<2x8x128xf32>
    %1 = vector.shape_cast %0 : vector<2x8x128xf32> to vector<16x128xf32>
    %c0_2 = arith.constant 0 : index
    %c0_3 = arith.constant 0 : index
    %2 = vector.load %arg2[%c0_2, %c0_3] : memref<128x64xf32, #tpu.memory_space<vmem>>, vector<128x64xf32>
    %cst = arith.constant dense<0.000000e+00> : vector<16x64xf32>
    %3 = tpu.matmul %1, %2, %cst {dimension_numbers = #tpu.dot_dimension_numbers<[1], [0], [0], [1], [0, 0, 1, 1], [], []>} : vector<16x128xf32>, vector<128x64xf32>, vector<16x64xf32> -> vector<16x64xf32>
    %4 = vector.shape_cast %3 : vector<16x64xf32> to vector<2x8x64xf32>
    %cst_4 = arith.constant dense<0xFF800000> : vector<2x64xf32>
    %5 = vector.multi_reduction <maximumf>, %4, %cst_4 [1] : vector<2x8x64xf32> to vector<2x64xf32>
    %6 = vector.shape_cast %5 : vector<2x64xf32> to vector<2x1x64xf32>
    %7 = vector.broadcast %6 : vector<2x1x64xf32> to vector<2x8x64xf32>
    %8 = arith.subf %4, %7 : vector<2x8x64xf32>
    %9 = math.exp %8 : vector<2x8x64xf32>
    %cst_5 = arith.constant dense<0.000000e+00> : vector<2x64xf32>
    %10 = vector.multi_reduction <add>, %9, %cst_5 [1] : vector<2x8x64xf32> to vector<2x64xf32>
    %11 = vector.shape_cast %10 : vector<2x64xf32> to vector<2x1x64xf32>
    %12 = tpu.reciprocal %11 {approx = true} : vector<2x1x64xf32> -> vector<2x1x64xf32>
    %13 = vector.broadcast %12 : vector<2x1x64xf32> to vector<2x8x64xf32>
    %14 = arith.mulf %9, %13 : vector<2x8x64xf32>
    %cst_6 = arith.constant dense<0.000000e+00> : vector<2x8xf32>
    %15 = vector.multi_reduction <add>, %14, %cst_6 [2] : vector<2x8x64xf32> to vector<2x8xf32>
    %16 = vector.shape_cast %15 : vector<2x8xf32> to vector<2x8x1xf32>
    %17 = tpu.reciprocal %16 {approx = true} : vector<2x8x1xf32> -> vector<2x8x1xf32>
    %18 = vector.broadcast %17 : vector<2x8x1xf32> to vector<2x8x64xf32>
    %19 = arith.mulf %14, %18 : vector<2x8x64xf32>
    %20 = vector.shape_cast %19 : vector<2x8x64xf32> to vector<16x64xf32>
    %c0_7 = arith.constant 0 : index
    %c0_8 = arith.constant 0 : index
    %21 = vector.load %arg3[%c0_7, %c0_8] : memref<64x128xf32, #tpu.memory_space<vmem>>, vector<64x128xf32>
    %cst_9 = arith.constant dense<0.000000e+00> : vector<16x128xf32>
    %22 = tpu.matmul %20, %21, %cst_9 {dimension_numbers = #tpu.dot_dimension_numbers<[1], [0], [0], [1], [0, 0, 1, 1], [], []>} : vector<16x64xf32>, vector<64x128xf32>, vector<16x128xf32> -> vector<16x128xf32>
    %23 = arith.addf %1, %22 : vector<16x128xf32>
    %24 = arith.truncf %23 : vector<16x128xf32> to vector<16x128xbf16>
    %c0_10 = arith.constant 0 : index
    %c0_11 = arith.constant 0 : index
    %25 = vector.load %arg4[%c0_10, %c0_11] : memref<128x512xbf16, #tpu.memory_space<vmem>>, vector<128x512xbf16>
    %cst_12 = arith.constant dense<0.000000e+00> : vector<16x512xf32>
    %26 = tpu.matmul %24, %25, %cst_12 {dimension_numbers = #tpu.dot_dimension_numbers<[1], [0], [0], [1], [0, 0, 1, 1], [], []>} : vector<16x128xbf16>, vector<128x512xbf16>, vector<16x512xf32> -> vector<16x512xf32>
    %cst_13 = arith.constant 0.000000e+00 : f32
    %27 = vector.broadcast %cst_13 : f32 to vector<16x512xf32>
    %28 = arith.cmpf oge, %26, %27 : vector<16x512xf32>
    %cst_14 = arith.constant 2.000000e-01 : f32
    %29 = vector.broadcast %cst_14 : f32 to vector<16x512xf32>
    %30 = arith.mulf %29, %26 : vector<16x512xf32>
    %31 = arith.select %28, %26, %30 : vector<16x512xi1>, vector<16x512xf32>
    %32 = arith.truncf %31 : vector<16x512xf32> to vector<16x512xbf16>
    %c0_15 = arith.constant 0 : index
    %c0_16 = arith.constant 0 : index
    %33 = vector.load %arg5[%c0_15, %c0_16] : memref<512x1024xbf16, #tpu.memory_space<vmem>>, vector<512x1024xbf16>
    %cst_17 = arith.constant dense<0.000000e+00> : vector<16x1024xf32>
    %34 = tpu.matmul %32, %33, %cst_17 {dimension_numbers = #tpu.dot_dimension_numbers<[1], [0], [0], [1], [0, 0, 1, 1], [], []>} : vector<16x512xbf16>, vector<512x1024xbf16>, vector<16x1024xf32> -> vector<16x1024xf32>
    %35 = vector.shape_cast %34 : vector<16x1024xf32> to vector<2x8x1024xf32>
    %c0_18 = arith.constant 0 : index
    %c0_19 = arith.constant 0 : index
    %c0_20 = arith.constant 0 : index
    %36 = vector.load %arg6[%c0_18, %c0_19, %c0_20] : memref<2x8x1024xf32, #tpu.memory_space<vmem>>, vector<2x8x1024xf32>
    tpu.vector_store %arg6[%c0_18, %c0_19, %c0_20], %35 {strides = array<i32>} : memref<2x8x1024xf32, #tpu.memory_space<vmem>>, vector<2x8x1024xf32>,
    return
  }
  func.func @transform_0(%arg0: i32) -> (i32, i32, i32) {
    %c0_i32 = arith.constant 0 : i32
    %c0_i32_0 = arith.constant 0 : i32
    %c0_i32_1 = arith.constant 0 : i32
    return %arg0, %c0_i32, %c0_i32_0 : i32, i32, i32
  }
  func.func @transform_1(%arg0: i32) -> (i32, i32) {
    %c0_i32 = arith.constant 0 : i32
    %c0_i32_0 = arith.constant 0 : i32
    %c0_i32_1 = arith.constant 0 : i32
    return %c0_i32, %c0_i32_0 : i32, i32
  }
  func.func @transform_2(%arg0: i32) -> (i32, i32) {
    %c0_i32 = arith.constant 0 : i32
    %c0_i32_0 = arith.constant 0 : i32
    %c0_i32_1 = arith.constant 0 : i32
    return %c0_i32, %c0_i32_0 : i32, i32
  }
  func.func @transform_3(%arg0: i32) -> (i32, i32) {
    %c0_i32 = arith.constant 0 : i32
    %c0_i32_0 = arith.constant 0 : i32
    %c0_i32_1 = arith.constant 0 : i32
    return %c0_i32, %c0_i32_0 : i32, i32
  }
  func.func @transform_4(%arg0: i32) -> (i32, i32) {
    %c0_i32 = arith.constant 0 : i32
    %c0_i32_0 = arith.constant 0 : i32
    %c0_i32_1 = arith.constant 0 : i32
    return %c0_i32, %c0_i32_0 : i32, i32
  }
  func.func @transform_5(%arg0: i32) -> (i32, i32, i32) {
    %c0_i32 = arith.constant 0 : i32
    %c0_i32_0 = arith.constant 0 : i32
    %c0_i32_1 = arith.constant 0 : i32
    return %arg0, %c0_i32, %c0_i32_0 : i32, i32, i32
  }
}

</mosaic_0001>

<bundles_post_ra>
// kernel: tpu_custom_call.1
= control target key start
LH: loop header
LB: loop body
LE: loop exit
PB: predicated region body
PF: predicated region fallthrough
CT: control target
= control target key end

     0   :  { %10 = vsyncpa [#allocation3], 0  ;;  %s3280_s0 = inlined_call_operand.vmem [shape: f32[2,8,128], index: 0, kind: input, shape index: {}]   ;;  %s3281_s1 = inlined_call_operand.vmem [shape: f32[128,64], index: 1, kind: input, shape index: {}]   ;;  %s3282_s2 = inlined_call_operand.vmem [shape: f32[64,128], index: 2, kind: input, shape index: {}]   ;;  %s3283_s3 = inlined_call_operand.hbm [shape: bf16[128,512], index: 3, kind: input, shape index: {}]   ;;  %s3284_s4 = inlined_call_operand.hbm [shape: bf16[512,1024], index: 4, kind: input, shape index: {}]   ;;  %s3285_s5 = inlined_call_operand.hbm [shape: f32[2,8,1024], index: 5, kind: output, shape index: {}]  }
   0x1   :  { %11 = vsyncpa [#allocation6], 0 }
   0x2   :  { %12 = vsyncpa [#allocation4], 0  ;;  %s3082_s18 = smov [#allocation2]   ;;  %s3010_s22 = scalar_lea.hbm %s3283_s3, 4096 }
   0x3   :  { %s24_s19 = sshll.u32 %s3082_s18, 4  ;;  %p3011_p0 = scmp.ne.s32.totalorder %s3283_s3, %s3010_s22  ;;  %s25_s19 = int_to_ptr.vmem [resolvable:$true] %s24_s19 }
   0x4   :  { %p3014_p1 = scmp.lt.u32.totalorder %s3010_s22, %s3283_s3 }
   0x6   :  { %p3016_p2 = pnand %p3014_p1, %p3011_p0 }
   0x8   :  { %3019 = shalt.err (!%p3016_p2)
}
   0x9   :  { %s3020_s27 = scalar_lea.vmem %s25_s19, 4096  ;;  %p3025_p4 = scmp.lt.s32.totalorder %s25_s19, %s25_s19 }
   0xa   :  { %p3021_p3 = scmp.ne.s32.totalorder %s25_s19, %s3020_s27  ;;  %p3026_p5 = scmp.lt.s32.totalorder %s3020_s27, %s3020_s27 }
   0xc   :  { %p3027_p6 = por %p3026_p5, %p3025_p4 }
   0xe   :  { %p3028_p7 = pnand %p3027_p6, %p3021_p3 }
  0x10   :  { %3031 = shalt.err (!%p3028_p7)
}
  0x11   :  { %s3083_s28 = smov 256   ;;  %s3084_s29 = smov 16  }
  0x12   :  { %30 = dma.hbm_to_vmem [thread:$0]  %s3283_s3, 4096, %s25_s19, [#allocation3], %s3083_s28, %s3083_s28, %s3084_s29  }
  0x13   :  { %s3085_s7 = smov [#allocation5]   ;;  %s3032_s11 = scalar_lea.hbm %s3284_s4, 32768 }
  0x14   :  { %s36_s8 = sshll.u32 %s3085_s7, 4  ;;  %p3033_p8 = scmp.ne.s32.totalorder %s3284_s4, %s3032_s11  ;;  %s37_s8 = int_to_ptr.vmem [resolvable:$true] %s36_s8 }
  0x15   :  { %p3036_p9 = scmp.lt.u32.totalorder %s3032_s11, %s3284_s4 }
  0x17   :  { %p3038_p10 = pnand %p3036_p9, %p3033_p8 }
  0x19   :  { %3041 = shalt.err (!%p3038_p10)
}
  0x1a   :  { %s3042_s16 = scalar_lea.vmem %s37_s8, 32768  ;;  %p3047_p12 = scmp.lt.s32.totalorder %s37_s8, %s37_s8 }
  0x1b   :  { %p3043_p11 = scmp.ne.s32.totalorder %s37_s8, %s3042_s16  ;;  %p3048_p13 = scmp.lt.s32.totalorder %s3042_s16, %s3042_s16 }
  0x1d   :  { %p3049_p0 = por %p3048_p13, %p3047_p12 }
  0x1f   :  { %p3050_p1 = pnand %p3049_p0, %p3043_p11 }
  0x21   :  { %3053 = shalt.err (!%p3050_p1)
}
  0x22   :  { %s3086_s3 = smov 512   ;;  %s3087_s17 = smov 32  }
  0x23   :  { %42 = dma.hbm_to_vmem [thread:$0]  %s3284_s4, 32768, %s37_s8, [#allocation6], %s3086_s3, %s3086_s3, %s3087_s17  }
  0x24   :  { %3076 = dma.done.wait [#allocation3], 4096  }
  0x25   :  { %3077 = vsyncadd [#allocation3], 4294963200 }
  0x26   :  { %3078 = dma.done.wait [#allocation6], 32768  }
  0x27   :  { %3079 = vsyncadd [#allocation6], 4294934528  ;;  %v52_v0 = vld [vmem:[%s3281_s1] sm:$0xff]  ;;  %v53_v1 = vld [vmem:[%s3281_s1 + $0x8] sm:$0xff]  ;;  %vm143_vm0 = vcmask 523264  }
  0x28   :  { %v54_v2 = vld [vmem:[%s3281_s1 + $0x10] sm:$0xff]  ;;  %v2876_v3 = vpack.c.bf16 %v53_v1, %v52_v0  ;;  %v55_v4 = vld [vmem:[%s3281_s1 + $0x18] sm:$0xff]  ;;  %v56_v6 = vld [vmem:[%s3281_s1 + $0x20] sm:$0xff] }
  0x29   :  { %v2880_v5 = vpack.c.bf16 %v55_v4, %v54_v2  ;;  %v57_v7 = vld [vmem:[%s3281_s1 + $0x28] sm:$0xff]  ;;  %v58_v9 = vld [vmem:[%s3281_s1 + $0x30] sm:$0xff]  ;;  %v59_v10 = vld [vmem:[%s3281_s1 + $0x38] sm:$0xff] }
  0x2a   :  { %2877 = vmatprep.subr.bf16.mxu0 %v2876_v3  ;;  %v2884_v8 = vpack.c.bf16 %v57_v7, %v56_v6  ;;  %v3173_v11 = vld [vmem:[%s3280_s0] sm:$0xff]  ;;  %v61_v13 = vld [vmem:[%s3281_s1 + $0x48] sm:$0xff]  ;;  %v2888_v14 = vpack.c.bf16 %v59_v10, %v58_v9  ;;  %v62_v15 = vld [vmem:[%s3281_s1 + $0x50] sm:$0xff] }
  0x2b   :  { %2879 = vmatpush3.bf16.msra.mxu0 %v2876_v3  ;;  %2854 = vmatprep.mubr.f32.mxu0 %v3173_v11  ;;  %v60_v12 = vld [vmem:[%s3281_s1 + $0x40] sm:$0xff]  ;;  %v63_v16 = vld [vmem:[%s3281_s1 + $0x58] sm:$0xff]  ;;  %v65_v20 = vld [vmem:[%s3281_s1 + $0x68] sm:$0xff] }
  0x2c   :  { %2881 = vmatprep.subr.bf16.mxu0 %v2880_v5  ;;  %v2892_v17 = vpack.c.bf16 %v61_v13, %v60_v12  ;;  %v2896_v18 = vpack.c.bf16 %v63_v16, %v62_v15  ;;  %v64_v19 = vld [vmem:[%s3281_s1 + $0x60] sm:$0xff]  ;;  %v66_v22 = vld [vmem:[%s3281_s1 + $0x70] sm:$0xff]  ;;  %v67_v23 = vld [vmem:[%s3281_s1 + $0x78] sm:$0xff] }
  0x2d   :  { %v2900_v21 = vpack.c.bf16 %v65_v20, %v64_v19  ;;  %v2904_v24 = vpack.c.bf16 %v67_v23, %v66_v22  ;;  %v3203_v25 = vld [vmem:[%s3280_s0 + $0x8] sm:$0xff]  ;;  %v192_v4 = vld [vmem:[%s3282_s2] sm:$0xff]  ;;  %v194_v7 = vld [vmem:[%s3282_s2 + $0x10] sm:$0xff] }
  0x2e   :  { %v196_v10 = vld [vmem:[%s3282_s2 + $0x20] sm:$0xff]  ;;  %v197_v12 = vld [vmem:[%s3282_s2 + $0x28] sm:$0xff]  ;;  %v198_v13 = vld [vmem:[%s3282_s2 + $0x30] sm:$0xff] }
  0x2f   :  { %2883 = vmatpush3.bf16.msra.mxu0 %v2880_v5  ;;  %v193_v5 = vld [vmem:[%s3282_s2 + $0x8] sm:$0xff]  ;;  %v199_v15 = vld [vmem:[%s3282_s2 + $0x38] sm:$0xff] }
  0x30   :  { %2885 = vmatprep.subr.bf16.mxu0 %v2884_v8  ;;  %v2908_v6 = vpack.c.bf16 %v193_v5, %v192_v4  ;;  %v2920_v16 = vpack.c.bf16 %v199_v15, %v198_v13  ;;  %v2955_v19 = vld [vmem:[#allocation2 + $0xc] ss:$16 sps:$4 sm:$0xff]   ;;  %v2965_v23 = vld [vmem:[#allocation2 + $0x48] ss:$16 sps:$4 sm:$0xff]   ;;  %v602_v5 = vld [vmem:[#allocation5 + $0x60] sm:$0xff] }
  0x31   :  { %v2961_v20 = vld [vmem:[#allocation2 + $0x2c] ss:$16 sps:$4 sm:$0xff]   ;;  %v606_v13 = vld [vmem:[#allocation5 + $0x80] sm:$0xff] }
  0x32   :  { %2909 = vmatprep.subr.bf16.mxu1 %v2908_v6  ;;  %v2967_v22 = vld [vmem:[#allocation2 + $0x4c] ss:$16 sps:$4 sm:$0xff]  }
  0x33   :  { %2887 = vmatpush3.bf16.msra.mxu0 %v2884_v8  ;;  %2911 = vmatpush3.bf16.msra.mxu1 %v2908_v6  ;;  %v195_v8 = vld [vmem:[%s3282_s2 + $0x18] sm:$0xff]  ;;  %v599_v6 = vld [vmem:[#allocation5 + $0x48] sm:$0xff]  ;;  %s3089_s2 = smov [#allocation7]  }
  0x34   :  { %2889 = vmatprep.subr.bf16.mxu0 %v2888_v14  ;;  %v2912_v9 = vpack.c.bf16 %v195_v8, %v194_v7  ;;  %v603_v7 = vld [vmem:[#allocation5 + $0x68] sm:$0xff]  ;;  %s2491_s3 = sshll.u32 %s3089_s2, 4  ;;  %s2492_s3 = int_to_ptr.vmem [resolvable:$true] %s2491_s3 }
  0x35   :  { %v607_v15 = vld [vmem:[#allocation5 + $0x88] sm:$0xff]  ;;  %s3054_s17 = scalar_lea.vmem %s2492_s3, 2048  ;;  %p3059_p3 = scmp.lt.s32.totalorder %s2492_s3, %s2492_s3 }
  0x36   :  { %2913 = vmatprep.subr.bf16.mxu1 %v2912_v9  ;;  %p3055_p2 = scmp.ne.s32.totalorder %s2492_s3, %s3054_s17  ;;  %p3060_p4 = scmp.lt.s32.totalorder %s3054_s17, %s3054_s17 }
  0x37   :  { %2891 = vmatpush3.bf16.msra.mxu0 %v2888_v14  ;;  %v2916_v14 = vpack.c.bf16 %v197_v12, %v196_v10  ;;  %2915 = vmatpush3.bf16.msra.mxu1 %v2912_v9  ;;  %v2549_v12 = vcombine.high %v599_v6, %v603_v7 }
  0x38   :  { %2893 = vmatprep.subr.bf16.mxu0 %v2892_v17  ;;  %p3061_p5 = por %p3060_p4, %p3059_p3 }
  0x39   :  { %2917 = vmatprep.subr.bf16.mxu1 %v2916_v14 }
  0x3a   :  { %p3062_p6 = pnand %p3061_p5, %p3055_p2 }
  0x3b   :  { %2895 = vmatpush3.bf16.msra.mxu0 %v2892_v17  ;;  %2919 = vmatpush3.bf16.msra.mxu1 %v2916_v14  ;;  %v2952_v17 = vld [vmem:[#allocation2 + $0x4] ss:$16 sps:$4 sm:$0xff]  }
  0x3c   :  { %2897 = vmatprep.subr.bf16.mxu0 %v2896_v18  ;;  %2921 = vmatprep.subr.bf16.mxu1 %v2920_v16  ;;  %v610_v14 = vld [vmem:[#allocation5 + $0xa0] sm:$0xff] }
  0x3f   :  { %2899 = vmatpush3.bf16.msra.mxu0 %v2896_v18  ;;  %2923 = vmatpush3.bf16.msra.mxu1 %v2920_v16  ;;  %v2953_v18 = vld [vmem:[#allocation2 + $0x8] ss:$16 sps:$4 sm:$0xff]  }
  0x40   :  { %2901 = vmatprep.subr.bf16.mxu0 %v2900_v21  ;;  %476 = vmatprep.subr.bf16.mxu1 %v2952_v17  ;;  %v611_v16 = vld [vmem:[#allocation5 + $0xa8] sm:$0xff] }
  0x43   :  { %2903 = vmatpush3.bf16.msra.mxu0 %v2900_v21  ;;  %v2959_v21 = vld [vmem:[#allocation2 + $0x28] ss:$16 sps:$4 sm:$0xff]  }
  0x44   :  { %2905 = vmatprep.subr.bf16.mxu0 %v2904_v24 }
  0x47   :  { %2907 = vmatpush3.bf16.msra.mxu0 %v2904_v24  ;;  %v2973_v24 = vld [vmem:[#allocation2 + $0x6c] ss:$16 sps:$4 sm:$0xff]  }
  0x48   :  { %519 = vmatprep.subr.bf16.mxu0 %v2955_v19  ;;  %v2557_v19 = vcombine.high %v607_v15, %v611_v16 }
  0x4a   :  { %2855 = vmatmul.mubr.f32.vlgmr.msra.gmra.mrb[0].mxu0 %v3203_v25 }
  0x4b   :  { %520 = vmatpush1.bf16.msra.mxu0 %v2953_v18  ;;  %v2548_v18 = vcombine.low %v599_v6, %v603_v7  ;;  %v663_v6 = vld [vmem:[#allocation5 + $0x248] sm:$0xff] }
  0x4c   :  { %521 = vmatprep.subr.bf16.mxu0 %v2961_v20  ;;  %v614_v20 = vld [vmem:[#allocation5 + $0xc0] sm:$0xff]  ;;  %v667_v7 = vld [vmem:[#allocation5 + $0x268] sm:$0xff] }
  0x4f   :  { %522 = vmatpush1.bf16.msra.mxu0 %v2959_v21  ;;  %v618_v21 = vld [vmem:[#allocation5 + $0xe0] sm:$0xff] }
  0x50   :  { %523 = vmatprep.subr.bf16.mxu0 %v2967_v22  ;;  %v619_v22 = vld [vmem:[#allocation5 + $0xe8] sm:$0xff] }
  0x53   :  { %524 = vmatpush1.bf16.msra.mxu0 %v2965_v23  ;;  %v2554_v23 = vcombine.low %v606_v13, %v610_v14 }
  0x54   :  { %525 = vmatprep.subr.bf16.mxu0 %v2973_v24  ;;  %v2556_v24 = vcombine.low %v607_v15, %v611_v16  ;;  %v671_v15 = vld [vmem:[#allocation5 + $0x288] sm:$0xff] }
  0x55   :  { %v675_v16 = vld [vmem:[#allocation5 + $0x2a8] sm:$0xff] }
 0x11d   :  { %v2856_v26 = vpop.f32.mrb[0].mxu0 }
 0x11e   :  { %v151_v27 = vsel %vm143_vm0, %v2856_v26, -inf  ;;  %v134_v28 = vpop.f32.mrb[1].mxu0 }
 0x11f   :  { %v152_v29 = vrot.slane %v151_v27, 4  ;;  %v144_v30 = vsel %vm143_vm0, %v134_v28, -inf }
 0x120   :  { %v145_v31 = vrot.slane %v144_v30, 4 }
 0x121   :  { %v153_v32 = vmax.f32 %v151_v27, %v152_v29  ;;  %v2979_v27 = vld [vmem:[#allocation2 + $0x8c] ss:$16 sps:$4 sm:$0xff]  }
 0x122   :  { %v146_v33 = vmax.f32 %v144_v30, %v145_v31  ;;  %v2985_v29 = vld [vmem:[#allocation2 + $0xac] ss:$16 sps:$4 sm:$0xff]   ;;  %v2983_v30 = vld [vmem:[#allocation2 + $0xa8] ss:$16 sps:$4 sm:$0xff]  }
 0x123   :  { %v154_v34 = vrot.slane %v153_v32, 2  ;;  %v2991_v31 = vld [vmem:[#allocation2 + $0xcc] ss:$16 sps:$4 sm:$0xff]  }
 0x124   :  { %v147_v35 = vrot.slane %v146_v33, 2 }
 0x125   :  { %v155_v36 = vmax.f32 %v153_v32, %v154_v34  ;;  %v2989_v32 = vld [vmem:[#allocation2 + $0xc8] ss:$16 sps:$4 sm:$0xff]  }
 0x126   :  { %v148_v37 = vmax.f32 %v146_v33, %v147_v35 }
 0x127   :  { %v156_v38 = vrot.slane %v155_v36, 1 }
 0x128   :  { %v149_v39 = vrot.slane %v148_v37, 1 }
 0x129   :  { %v157_v40 = vmax.f32 %v155_v36, %v156_v38  ;;  %v2950_v38 = vld [vmem:[#allocation2] ss:$16 sps:$4 sm:$0xff]  }
 0x12a   :  { %v150_v41 = vmax.f32 %v148_v37, %v149_v39 }
 0x12b   :  { %v159_v42 = vsub.f32 %v2856_v26, %v157_v40  ;;  %v2971_v26 = vld [vmem:[#allocation2 + $0x68] ss:$16 sps:$4 sm:$0xff]   ;;  %v2958_v40 = vld [vmem:[#allocation2 + $0x24] ss:$16 sps:$4 sm:$0xff]  }
 0x12c   :  { %v158_v43 = vsub.f32 %v134_v28, %v150_v41  ;;  %526 = vmatpush1.bf16.msra.mxu0 %v2971_v26  ;;  %v2977_v28 = vld [vmem:[#allocation2 + $0x88] ss:$16 sps:$4 sm:$0xff]   ;;  %v2956_v41 = vld [vmem:[#allocation2 + $0x20] ss:$16 sps:$4 sm:$0xff]   ;;  %v2563_v26 = vcombine.high %v614_v20, %v618_v21 }
 0x12d   :  { %v162_v44 = vmul.f32 1.442695, %v159_v42  ;;  %527 = vmatprep.subr.bf16.mxu0 %v2979_v27  ;;  %v2964_v42 = vld [vmem:[#allocation2 + $0x44] ss:$16 sps:$4 sm:$0xff]  }
 0x12e   :  { %v160_v45 = vmul.f32 1.442695, %v158_v43  ;;  %v2962_v43 = vld [vmem:[#allocation2 + $0x40] ss:$16 sps:$4 sm:$0xff]  }
 0x12f   :  { %2998 = vpow2.f32 %v162_v44  ;;  %v2970_v44 = vld [vmem:[#allocation2 + $0x64] ss:$16 sps:$4 sm:$0xff]  }
 0x130   :  { %3000 = vpow2.f32 %v160_v45  ;;  %528 = vmatpush1.bf16.msra.mxu0 %v2977_v28  ;;  %v2968_v45 = vld [vmem:[#allocation2 + $0x60] ss:$16 sps:$4 sm:$0xff]  }
 0x131   :  { %529 = vmatprep.subr.bf16.mxu0 %v2985_v29  ;;  %v622_v28 = vld [vmem:[#allocation5 + $0x100] sm:$0xff] }
 0x132   :  { %v626_v29 = vld [vmem:[#allocation5 + $0x120] sm:$0xff] }
 0x134   :  { %530 = vmatpush1.bf16.msra.mxu0 %v2983_v30  ;;  %v623_v30 = vld [vmem:[#allocation5 + $0x108] sm:$0xff] }
 0x135   :  { %531 = vmatprep.subr.bf16.mxu0 %v2991_v31  ;;  %v627_v31 = vld [vmem:[#allocation5 + $0x128] sm:$0xff] }
 0x138   :  { %532 = vmatpush1.bf16.msra.mxu0 %v2989_v32  ;;  %v2562_v32 = vcombine.low %v614_v20, %v618_v21  ;;  %v678_v20 = vld [vmem:[#allocation5 + $0x2c0] sm:$0xff] }
 0x139   :  { %v2999_v46 = vpop.eup %2998  ;;  %v682_v21 = vld [vmem:[#allocation5 + $0x2e0] sm:$0xff] }
 0x13a   :  { %v3001_v47 = vpop.eup %3000  ;;  %v171_v48 = vsel %vm143_vm0, %v2999_v46, 0.0 }
 0x13b   :  { %v172_v49 = vrot.slane %v171_v48, 4  ;;  %v164_v50 = vsel %vm143_vm0, %v3001_v47, 0.0 }
 0x13c   :  { %v165_v51 = vrot.slane %v164_v50, 4 }
 0x13d   :  { %v173_v52 = vadd.f32 %v172_v49, %v171_v48  ;;  %v2982_v48 = vld [vmem:[#allocation2 + $0xa4] ss:$16 sps:$4 sm:$0xff]   ;;  %v2980_v49 = vld [vmem:[#allocation2 + $0xa0] ss:$16 sps:$4 sm:$0xff]  }
 0x13e   :  { %v166_v53 = vadd.f32 %v165_v51, %v164_v50  ;;  %v2988_v50 = vld [vmem:[#allocation2 + $0xc4] ss:$16 sps:$4 sm:$0xff]   ;;  %v2986_v51 = vld [vmem:[#allocation2 + $0xc0] ss:$16 sps:$4 sm:$0xff]  }
 0x13f   :  { %v174_v54 = vrot.slane %v173_v52, 2 }
 0x140   :  { %v167_v55 = vrot.slane %v166_v53, 2 }
 0x141   :  { %v175_v56 = vadd.f32 %v174_v54, %v173_v52  ;;  %v2994_v52 = vld [vmem:[#allocation2 + $0xe4] ss:$16 sps:$4 sm:$0xff]   ;;  %v2992_v54 = vld [vmem:[#allocation2 + $0xe0] ss:$16 sps:$4 sm:$0xff]  }
 0x142   :  { %v168_v57 = vadd.f32 %v167_v55, %v166_v53  ;;  %v2997_v53 = vld [vmem:[#allocation2 + $0xec] ss:$16 sps:$4 sm:$0xff]   ;;  %v2995_v55 = vld [vmem:[#allocation2 + $0xe8] ss:$16 sps:$4 sm:$0xff]  }
 0x143   :  { %v176_v58 = vrot.slane %v175_v56, 1  ;;  %533 = vmatprep.subr.bf16.mxu0 %v2997_v53  ;;  %v650_v53 = vld [vmem:[#allocation5 + $0x1e0] sm:$0xff] }
 0x144   :  { %v169_v59 = vrot.slane %v168_v57, 1  ;;  %534 = vmatpush1.bf16.msra.mxu0 %v2995_v55  ;;  %v651_v55 = vld [vmem:[#allocation5 + $0x1e8] sm:$0xff] }
 0x145   :  { %v177_v60 = vadd.f32 %v176_v58, %v175_v56  ;;  %v3088_v56 = vmov 0   ;;  %v594_v58 = vld [vmem:[#allocation5 + $0x20] sm:$0xff] }
 0x146   :  { %v170_v61 = vadd.f32 %v169_v59, %v168_v57  ;;  %551 = vmatprep.mubr.bf16.mxu0 %v3088_v56  ;;  %v590_v57 = vld [vmem:[#allocation5] sm:$0xff]  ;;  %v591_v59 = vld [vmem:[#allocation5 + $0x8] sm:$0xff] }
 0x147   :  { %3002 = vrcp.f32 %v177_v60  ;;  %v2538_v60 = vcombine.low %v590_v57, %v594_v58 }
 0x148   :  { %3004 = vrcp.f32 %v170_v61  ;;  %v2539_v61 = vcombine.high %v590_v57, %v594_v58 }
 0x151   :  { %v3003_v62 = vpop.eup %3002 }
 0x152   :  { %v3005_v63 = vpop.eup %3004  ;;  %v3211_v2 = vmul.f32 %v3003_v62, %v2999_v46  ;;  %v2976_v46 = vld [vmem:[#allocation2 + $0x84] ss:$16 sps:$4 sm:$0xff]   ;;  %v595_v62 = vld [vmem:[#allocation5 + $0x28] sm:$0xff] }
 0x153   :  { %v180_v0 = vmul.f32 %v3005_v63, %v3001_v47  ;;  %v2974_v47 = vld [vmem:[#allocation2 + $0x80] ss:$16 sps:$4 sm:$0xff]   ;;  %v2540_v63 = vcombine.low %v591_v59, %v595_v62 }
 0x154   :  { %v185_v3 = vsel %vm143_vm0, %v3211_v2, 0.0 }
 0x155   :  { %v182_v1 = vsel %vm143_vm0, %v180_v0, 0.0 }
 0x156   :  { %183 = vadd.xlane.f32.xlu0 %v182_v1 }
 0x15a   :  { %186 = vadd.xlane.f32.xlu0 %v185_v3 }
 0x1e3   :  { %v184_v33 = vpop.xlane.xlu0 %183 }
 0x1e4   :  { %3006 = vrcp.f32 %v184_v33 }
 0x1e7   :  { %v187_v34 = vpop.xlane.xlu0 %186 }
 0x1e8   :  { %3008 = vrcp.f32 %v187_v34  ;;  %v2571_v34 = vcombine.high %v622_v28, %v626_v29 }
 0x1ee   :  { %v3007_v35 = vpop.eup %3006 }
 0x1ef   :  { %v190_v36 = vmul.f32 %v3007_v35, %v180_v0  ;;  %v2541_v0 = vcombine.high %v591_v59, %v595_v62  ;;  %v2573_v35 = vcombine.high %v623_v30, %v627_v31  ;;  %v655_v62 = vld [vmem:[#allocation5 + $0x208] sm:$0xff] }
 0x1f1   :  { %2873 = vmatprep.mubr.msk.f32.mxu1 %vm143_vm0, %v190_v36  ;;  %2212 = vmatprep.subr.bf16.mxu0 %v2541_v0  ;;  %v630_v36 = vld [vmem:[#allocation5 + $0x140] sm:$0xff] }
 0x1f2   :  { %v3009_v37 = vpop.eup %3008 }
 0x1f3   :  { %v191_v39 = vmul.f32 %v3009_v37, %v3211_v2  ;;  %v598_v2 = vld [vmem:[#allocation5 + $0x40] sm:$0xff] }
 0x1f4   :  { %v2547_v10 = vcombine.high %v598_v2, %v602_v5  ;;  %v2546_v17 = vcombine.low %v598_v2, %v602_v5  ;;  %v634_v37 = vld [vmem:[#allocation5 + $0x160] sm:$0xff] }
 0x1f5   :  { %2874 = vmatmul.mubr.msk.f32.vlgmr.msra.gmra.mrb[0].mxu1 %vm143_vm0, %v191_v39  ;;  %v635_v39 = vld [vmem:[#allocation5 + $0x168] sm:$0xff]  ;;  %v666_v5 = vld [vmem:[#allocation5 + $0x260] sm:$0xff] }
 0x1f6   :  { %477 = vmatpush1.bf16.msra.mxu1 %v2950_v38  ;;  %508 = vmatprep.mubr.bf16.mxu1 %v3088_v56  ;;  %v631_v38 = vld [vmem:[#allocation5 + $0x148] sm:$0xff] }
 0x1f7   :  { %478 = vmatprep.subr.bf16.mxu1 %v2958_v40  ;;  %v2570_v40 = vcombine.low %v622_v28, %v626_v29  ;;  %v686_v28 = vld [vmem:[#allocation5 + $0x300] sm:$0xff] }
 0x1f8   :  { %v690_v29 = vld [vmem:[#allocation5 + $0x320] sm:$0xff] }
 0x1fa   :  { %479 = vmatpush1.bf16.msra.mxu1 %v2956_v41  ;;  %v2572_v41 = vcombine.low %v623_v30, %v627_v31  ;;  %v687_v30 = vld [vmem:[#allocation5 + $0x308] sm:$0xff] }
 0x1fb   :  { %480 = vmatprep.subr.bf16.mxu1 %v2964_v42  ;;  %v2579_v42 = vcombine.high %v630_v36, %v634_v37  ;;  %v691_v31 = vld [vmem:[#allocation5 + $0x328] sm:$0xff] }
 0x1fe   :  { %481 = vmatpush1.bf16.msra.mxu1 %v2962_v43  ;;  %v2581_v43 = vcombine.high %v631_v38, %v635_v39 }
 0x1ff   :  { %482 = vmatprep.subr.bf16.mxu1 %v2970_v44  ;;  %v638_v44 = vld [vmem:[#allocation5 + $0x180] sm:$0xff] }
 0x202   :  { %483 = vmatpush1.bf16.msra.mxu1 %v2968_v45  ;;  %v642_v45 = vld [vmem:[#allocation5 + $0x1a0] sm:$0xff] }
 0x203   :  { %484 = vmatprep.subr.bf16.mxu1 %v2976_v46  ;;  %v639_v46 = vld [vmem:[#allocation5 + $0x188] sm:$0xff]  ;;  %v2586_v56 = vcombine.low %v638_v44, %v642_v45 }
 0x206   :  { %485 = vmatpush1.bf16.msra.mxu1 %v2974_v47  ;;  %v643_v47 = vld [vmem:[#allocation5 + $0x1a8] sm:$0xff] }
 0x207   :  { %486 = vmatprep.subr.bf16.mxu1 %v2982_v48  ;;  %v2578_v48 = vcombine.low %v630_v36, %v634_v37  ;;  %v2588_v57 = vcombine.low %v639_v46, %v643_v47  ;;  %v694_v36 = vld [vmem:[#allocation5 + $0x340] sm:$0xff] }
 0x208   :  { %v698_v37 = vld [vmem:[#allocation5 + $0x360] sm:$0xff] }
 0x20a   :  { %487 = vmatpush1.bf16.msra.mxu1 %v2980_v49  ;;  %v2580_v49 = vcombine.low %v631_v38, %v635_v39  ;;  %v695_v38 = vld [vmem:[#allocation5 + $0x348] sm:$0xff] }
 0x20b   :  { %488 = vmatprep.subr.bf16.mxu1 %v2988_v50  ;;  %v2587_v50 = vcombine.high %v638_v44, %v642_v45  ;;  %v699_v39 = vld [vmem:[#allocation5 + $0x368] sm:$0xff]  ;;  %v2642_v44 = vcombine.low %v694_v36, %v698_v37 }
 0x20c   :  { %v2644_v45 = vcombine.low %v695_v38, %v699_v39 }
 0x20e   :  { %489 = vmatpush1.bf16.msra.mxu1 %v2986_v51  ;;  %v2589_v51 = vcombine.high %v639_v46, %v643_v47  ;;  %v702_v46 = vld [vmem:[#allocation5 + $0x380] sm:$0xff] }
 0x20f   :  { %490 = vmatprep.subr.bf16.mxu1 %v2994_v52  ;;  %v646_v52 = vld [vmem:[#allocation5 + $0x1c0] sm:$0xff] }
 0x210   :  { %v2595_v58 = vcombine.high %v646_v52, %v650_v53  ;;  %v2594_v0 = vcombine.low %v646_v52, %v650_v53  ;;  %v706_v47 = vld [vmem:[#allocation5 + $0x3a0] sm:$0xff] }
 0x212   :  { %491 = vmatpush1.bf16.msra.mxu1 %v2992_v54  ;;  %v647_v54 = vld [vmem:[#allocation5 + $0x1c8] sm:$0xff] }
 0x213   :  { %2126 = vmatprep.subr.bf16.mxu1 %v2539_v61  ;;  %v2597_v59 = vcombine.high %v647_v54, %v651_v55  ;;  %v658_v61 = vld [vmem:[#allocation5 + $0x220] sm:$0xff] }
 0x2c8   :  { %v2875_v1 = vpop.f32.mrb[0].mxu1 }
 0x2c9   :  { %v282_v3 = vadd.f32 %v2875_v1, %v3203_v25  ;;  %v272_v4 = vpop.f32.mrb[1].mxu1  ;;  %v2555_v25 = vcombine.high %v606_v13, %v610_v14  ;;  %v2596_v1 = vcombine.low %v647_v54, %v651_v55  ;;  %v670_v13 = vld [vmem:[#allocation5 + $0x280] sm:$0xff] }
 0x2ca   :  { %v281_v8 = vadd.f32 %v272_v4, %v3173_v11  ;;  %v615_v11 = vld [vmem:[#allocation5 + $0xc8] sm:$0xff]  ;;  %v662_v4 = vld [vmem:[#allocation5 + $0x240] sm:$0xff] }
 0x2cb   :  { %v2565_v27 = vcombine.high %v615_v11, %v619_v22  ;;  %v2564_v33 = vcombine.low %v615_v11, %v619_v22  ;;  %v674_v14 = vld [vmem:[#allocation5 + $0x2a0] sm:$0xff]  ;;  %v679_v11 = vld [vmem:[#allocation5 + $0x2c8] sm:$0xff] }
 0x2cc   :  { %v283_v9 = vpack.c.bf16 %v282_v3, %v281_v8  ;;  %v683_v22 = vld [vmem:[#allocation5 + $0x2e8] sm:$0xff]  ;;  %v710_v54 = vld [vmem:[#allocation5 + $0x3c0] sm:$0xff] }
 0x2cd   :  { %v714_v55 = vld [vmem:[#allocation5 + $0x3e0] sm:$0xff] }
 0x2ce   :  { %509 = vmatmul.mubr.bf16.vlgmr.msra.gmra.mrb[4].mxu1 %v283_v9  ;;  %552 = vmatmul.mubr.bf16.vlgmr.msra.gmra.mrb[4].mxu0 %v283_v9 }
 0x2cf   :  { %2127 = vmatpush1.bf16.msra.mxu1 %v2538_v60  ;;  %2213 = vmatpush1.bf16.msra.mxu0 %v2540_v63  ;;  %v654_v60 = vld [vmem:[#allocation5 + $0x200] sm:$0xff]  ;;  %v659_v63 = vld [vmem:[#allocation5 + $0x228] sm:$0xff] }
 0x2d0   :  { %2128 = vmatprep.subr.bf16.mxu1 %v2547_v10  ;;  %2214 = vmatprep.subr.bf16.mxu0 %v2549_v12  ;;  %v2603_v2 = vcombine.high %v654_v60, %v658_v61  ;;  %v2605_v3 = vcombine.high %v655_v62, %v659_v63  ;;  %v2602_v8 = vcombine.low %v654_v60, %v658_v61 }
 0x2d1   :  { %v2604_v9 = vcombine.low %v655_v62, %v659_v63  ;;  %v2611_v10 = vcombine.high %v662_v4, %v666_v5  ;;  %v2613_v12 = vcombine.high %v663_v6, %v667_v7  ;;  %v718_v62 = vld [vmem:[#allocation5 + $0x400] sm:$0xff] }
 0x2d2   :  { %v722_v63 = vld [vmem:[#allocation5 + $0x420] sm:$0xff] }
 0x2d3   :  { %2129 = vmatpush1.bf16.msra.mxu1 %v2546_v17  ;;  %2215 = vmatpush1.bf16.msra.mxu0 %v2548_v18  ;;  %v2610_v17 = vcombine.low %v662_v4, %v666_v5  ;;  %v2612_v18 = vcombine.low %v663_v6, %v667_v7 }
 0x2d4   :  { %2130 = vmatprep.subr.bf16.mxu1 %v2555_v25  ;;  %2216 = vmatprep.subr.bf16.mxu0 %v2557_v19  ;;  %v2619_v25 = vcombine.high %v670_v13, %v674_v14  ;;  %v2621_v19 = vcombine.high %v671_v15, %v675_v16 }
 0x2d7   :  { %2131 = vmatpush1.bf16.msra.mxu1 %v2554_v23  ;;  %2217 = vmatpush1.bf16.msra.mxu0 %v2556_v24  ;;  %v2618_v23 = vcombine.low %v670_v13, %v674_v14  ;;  %v2620_v24 = vcombine.low %v671_v15, %v675_v16 }
 0x2d8   :  { %2132 = vmatprep.subr.bf16.mxu1 %v2563_v26  ;;  %2218 = vmatprep.subr.bf16.mxu0 %v2565_v27  ;;  %v2627_v26 = vcombine.high %v678_v20, %v682_v21  ;;  %v2629_v27 = vcombine.high %v679_v11, %v683_v22 }
 0x2db   :  { %2133 = vmatpush1.bf16.msra.mxu1 %v2562_v32  ;;  %2219 = vmatpush1.bf16.msra.mxu0 %v2564_v33  ;;  %v2626_v32 = vcombine.low %v678_v20, %v682_v21  ;;  %v2628_v33 = vcombine.low %v679_v11, %v683_v22 }
 0x2dc   :  { %2134 = vmatprep.subr.bf16.mxu1 %v2571_v34  ;;  %2220 = vmatprep.subr.bf16.mxu0 %v2573_v35  ;;  %v2635_v34 = vcombine.high %v686_v28, %v690_v29  ;;  %v2637_v35 = vcombine.high %v687_v30, %v691_v31 }
 0x2df   :  { %2135 = vmatpush1.bf16.msra.mxu1 %v2570_v40  ;;  %2221 = vmatpush1.bf16.msra.mxu0 %v2572_v41  ;;  %v2634_v40 = vcombine.low %v686_v28, %v690_v29  ;;  %v2636_v41 = vcombine.low %v687_v30, %v691_v31  ;;  %v730_v31 = vld [vmem:[#allocation5 + $0x460] sm:$0xff] }
 0x2e0   :  { %2136 = vmatprep.subr.bf16.mxu1 %v2579_v42  ;;  %2222 = vmatprep.subr.bf16.mxu0 %v2581_v43  ;;  %v2643_v42 = vcombine.high %v694_v36, %v698_v37  ;;  %v2645_v43 = vcombine.high %v695_v38, %v699_v39  ;;  %v734_v38 = vld [vmem:[#allocation5 + $0x480] sm:$0xff] }
 0x2e3   :  { %2137 = vmatpush1.bf16.msra.mxu1 %v2578_v48  ;;  %2223 = vmatpush1.bf16.msra.mxu0 %v2580_v49  ;;  %v703_v48 = vld [vmem:[#allocation5 + $0x388] sm:$0xff]  ;;  %v2651_v49 = vcombine.high %v702_v46, %v706_v47 }
 0x2e4   :  { %2138 = vmatprep.subr.bf16.mxu1 %v2587_v50  ;;  %2224 = vmatprep.subr.bf16.mxu0 %v2589_v51  ;;  %v707_v50 = vld [vmem:[#allocation5 + $0x3a8] sm:$0xff]  ;;  %v2650_v51 = vcombine.low %v702_v46, %v706_v47 }
 0x2e5   :  { %v2652_v52 = vcombine.low %v703_v48, %v707_v50  ;;  %v2653_v53 = vcombine.high %v703_v48, %v707_v50  ;;  %v742_v48 = vld [vmem:[#allocation5 + $0x4c0] sm:$0xff]  ;;  %v743_v50 = vld [vmem:[#allocation5 + $0x4c8] sm:$0xff] }
 0x2e7   :  { %2139 = vmatpush1.bf16.msra.mxu1 %v2586_v56  ;;  %2225 = vmatpush1.bf16.msra.mxu0 %v2588_v57  ;;  %v711_v56 = vld [vmem:[#allocation5 + $0x3c8] sm:$0xff]  ;;  %v2659_v57 = vcombine.high %v710_v54, %v714_v55 }
 0x2e8   :  { %2140 = vmatprep.subr.bf16.mxu1 %v2595_v58  ;;  %2226 = vmatprep.subr.bf16.mxu0 %v2597_v59  ;;  %v715_v58 = vld [vmem:[#allocation5 + $0x3e8] sm:$0xff]  ;;  %v2658_v59 = vcombine.low %v710_v54, %v714_v55 }
 0x2e9   :  { %v2660_v60 = vcombine.low %v711_v56, %v715_v58  ;;  %v2661_v61 = vcombine.high %v711_v56, %v715_v58  ;;  %v750_v56 = vld [vmem:[#allocation5 + $0x500] sm:$0xff]  ;;  %v751_v58 = vld [vmem:[#allocation5 + $0x508] sm:$0xff] }
 0x2eb   :  { %2141 = vmatpush1.bf16.msra.mxu1 %v2594_v0  ;;  %2227 = vmatpush1.bf16.msra.mxu0 %v2596_v1  ;;  %v719_v0 = vld [vmem:[#allocation5 + $0x408] sm:$0xff]  ;;  %v2667_v1 = vcombine.high %v718_v62, %v722_v63 }
 0x2ec   :  { %2142 = vmatprep.subr.bf16.mxu1 %v2603_v2  ;;  %2228 = vmatprep.subr.bf16.mxu0 %v2605_v3  ;;  %v723_v2 = vld [vmem:[#allocation5 + $0x428] sm:$0xff]  ;;  %v2666_v3 = vcombine.low %v718_v62, %v722_v63 }
 0x2ed   :  { %v2668_v4 = vcombine.low %v719_v0, %v723_v2  ;;  %v2669_v5 = vcombine.high %v719_v0, %v723_v2  ;;  %v758_v0 = vld [vmem:[#allocation5 + $0x540] sm:$0xff]  ;;  %v759_v2 = vld [vmem:[#allocation5 + $0x548] sm:$0xff] }
 0x2ef   :  { %2143 = vmatpush1.bf16.msra.mxu1 %v2602_v8  ;;  %2229 = vmatpush1.bf16.msra.mxu0 %v2604_v9 }
 0x2f0   :  { %2144 = vmatprep.subr.bf16.mxu1 %v2611_v10  ;;  %2230 = vmatprep.subr.bf16.mxu0 %v2613_v12 }
 0x2f3   :  { %2145 = vmatpush1.bf16.msra.mxu1 %v2610_v17  ;;  %2231 = vmatpush1.bf16.msra.mxu0 %v2612_v18 }
 0x2f4   :  { %2146 = vmatprep.subr.bf16.mxu1 %v2619_v25  ;;  %2232 = vmatprep.subr.bf16.mxu0 %v2621_v19 }
 0x2f7   :  { %2147 = vmatpush1.bf16.msra.mxu1 %v2618_v23  ;;  %2233 = vmatpush1.bf16.msra.mxu0 %v2620_v24 }
 0x2f8   :  { %2148 = vmatprep.subr.bf16.mxu1 %v2627_v26  ;;  %2234 = vmatprep.subr.bf16.mxu0 %v2629_v27  ;;  %v726_v27 = vld [vmem:[#allocation5 + $0x440] sm:$0xff] }
 0x2f9   :  { %v2675_v39 = vcombine.high %v726_v27, %v730_v31 }
 0x2fb   :  { %2149 = vmatpush1.bf16.msra.mxu1 %v2626_v32  ;;  %2235 = vmatpush1.bf16.msra.mxu0 %v2628_v33  ;;  %v727_v32 = vld [vmem:[#allocation5 + $0x448] sm:$0xff] }
 0x2fc   :  { %2150 = vmatprep.subr.bf16.mxu1 %v2635_v34  ;;  %2236 = vmatprep.subr.bf16.mxu0 %v2637_v35  ;;  %v731_v33 = vld [vmem:[#allocation5 + $0x468] sm:$0xff] }
 0x2ff   :  { %2151 = vmatpush1.bf16.msra.mxu1 %v2634_v40  ;;  %2237 = vmatpush1.bf16.msra.mxu0 %v2636_v41  ;;  %v2677_v40 = vcombine.high %v727_v32, %v731_v33  ;;  %v738_v41 = vld [vmem:[#allocation5 + $0x4a0] sm:$0xff] }
 0x300   :  { %2152 = vmatprep.subr.bf16.mxu1 %v2643_v42  ;;  %2238 = vmatprep.subr.bf16.mxu0 %v2645_v43  ;;  %v735_v42 = vld [vmem:[#allocation5 + $0x488] sm:$0xff]  ;;  %v2683_v46 = vcombine.high %v734_v38, %v738_v41 }
 0x301   :  { %v739_v43 = vld [vmem:[#allocation5 + $0x4a8] sm:$0xff] }
 0x302   :  { %v2685_v47 = vcombine.high %v735_v42, %v739_v43 }
 0x303   :  { %2153 = vmatpush1.bf16.msra.mxu1 %v2642_v44  ;;  %2239 = vmatpush1.bf16.msra.mxu0 %v2644_v45  ;;  %v2674_v44 = vcombine.low %v726_v27, %v730_v31  ;;  %v2676_v45 = vcombine.low %v727_v32, %v731_v33  ;;  %v783_v27 = vld [vmem:[#allocation5 + $0x608] sm:$0xff] }
 0x304   :  { %2154 = vmatprep.subr.bf16.mxu1 %v2651_v49  ;;  %2240 = vmatprep.subr.bf16.mxu0 %v2653_v53  ;;  %v746_v49 = vld [vmem:[#allocation5 + $0x4e0] sm:$0xff]  ;;  %v2684_v53 = vcombine.low %v735_v42, %v739_v43 }
 0x305   :  { %v2691_v54 = vcombine.high %v742_v48, %v746_v49 }
 0x307   :  { %2155 = vmatpush1.bf16.msra.mxu1 %v2650_v51  ;;  %2241 = vmatpush1.bf16.msra.mxu0 %v2652_v52  ;;  %v747_v51 = vld [vmem:[#allocation5 + $0x4e8] sm:$0xff]  ;;  %v2682_v52 = vcombine.low %v734_v38, %v738_v41 }
 0x308   :  { %2156 = vmatprep.subr.bf16.mxu1 %v2659_v57  ;;  %2242 = vmatprep.subr.bf16.mxu0 %v2661_v61  ;;  %v2693_v55 = vcombine.high %v743_v50, %v747_v51  ;;  %v754_v57 = vld [vmem:[#allocation5 + $0x520] sm:$0xff]  ;;  %v2692_v61 = vcombine.low %v743_v50, %v747_v51  ;;  %v791_v38 = vld [vmem:[#allocation5 + $0x648] sm:$0xff] }
 0x309   :  { %v2699_v62 = vcombine.high %v750_v56, %v754_v57 }
 0x30b   :  { %2157 = vmatpush1.bf16.msra.mxu1 %v2658_v59  ;;  %2243 = vmatpush1.bf16.msra.mxu0 %v2660_v60  ;;  %v755_v59 = vld [vmem:[#allocation5 + $0x528] sm:$0xff]  ;;  %v2690_v60 = vcombine.low %v742_v48, %v746_v49 }
 0x30c   :  { %2169 = vmatprep.subr.bf16.mxu1 %v2667_v1  ;;  %2255 = vmatprep.subr.bf16.mxu0 %v2669_v5  ;;  %v2701_v63 = vcombine.high %v751_v58, %v755_v59  ;;  %v762_v1 = vld [vmem:[#allocation5 + $0x560] sm:$0xff]  ;;  %v2700_v5 = vcombine.low %v751_v58, %v755_v59 }
 0x3a1   :  { %v510_v6 = vpop.f32.mrb[4].mxu1  ;;  %v553_v7 = vpop.f32.mrb[4].mxu0 }
 0x3a2   :  { %vm562_vm1 = vcmp.ge.f32.partialorder %v510_v6, 0.0  ;;  %v570_v8 = vmul.f32 0.2, %v510_v6  ;;  %v572_v9 = vmul.f32 0.2, %v553_v7  ;;  %vm564_vm2 = vcmp.ge.f32.partialorder %v553_v7, 0.0 }
 0x3a3   :  { %v512_v10 = vpop.f32.mrb[5].mxu1  ;;  %v555_v12 = vpop.f32.mrb[5].mxu0 }
 0x3a4   :  { %v571_v13 = vmul.f32 0.2, %v512_v10  ;;  %v514_v14 = vpop.f32.mrb[6].mxu1  ;;  %v557_v15 = vpop.f32.mrb[6].mxu0  ;;  %v578_v16 = vsel %vm562_vm1, %v510_v6, %v570_v8  ;;  %v573_v17 = vmul.f32 0.2, %v555_v12  ;;  %v580_v25 = vsel %vm564_vm2, %v553_v7, %v572_v9 }
 0x3a5   :  { %vm566_vm3 = vcmp.ge.f32.partialorder %v514_v14, 0.0  ;;  %v574_v18 = vmul.f32 0.2, %v514_v14  ;;  %vm563_vm4 = vcmp.ge.f32.partialorder %v512_v10, 0.0  ;;  %vm568_vm5 = vcmp.ge.f32.partialorder %v557_v15, 0.0  ;;  %v516_v20 = vpop.f32.mrb[7].mxu1 }
 0x3a6   :  { %v576_v19 = vmul.f32 0.2, %v557_v15  ;;  %v559_v21 = vpop.f32.mrb[7].mxu0  ;;  %vm565_vm6 = vcmp.ge.f32.partialorder %v555_v12, 0.0  ;;  %vm567_vm7 = vcmp.ge.f32.partialorder %v516_v20, 0.0  ;;  %v579_v28 = vsel %vm563_vm4, %v512_v10, %v571_v13  ;;  %v766_v8 = vld [vmem:[#allocation5 + $0x580] sm:$0xff] }
 0x3a7   :  { %v582_v11 = vsel %vm566_vm3, %v514_v14, %v574_v18  ;;  %v575_v22 = vmul.f32 0.2, %v516_v20  ;;  %vm569_vm8 = vcmp.ge.f32.partialorder %v559_v21, 0.0  ;;  %v577_v26 = vmul.f32 0.2, %v559_v21  ;;  %v770_v9 = vld [vmem:[#allocation5 + $0x5a0] sm:$0xff] }
 0x3a8   :  { %v3244_v23 = vpack.c.bf16 %v582_v11, %v578_v16  ;;  %v584_v24 = vsel %vm568_vm5, %v557_v15, %v576_v19  ;;  %v581_v34 = vsel %vm565_vm6, %v555_v12, %v573_v17  ;;  %v2707_v6 = vcombine.high %v758_v0, %v762_v1  ;;  %v767_v10 = vld [vmem:[#allocation5 + $0x588] sm:$0xff]  ;;  %v774_v17 = vld [vmem:[#allocation5 + $0x5c0] sm:$0xff] }
 0x3a9   :  { %v3246_v29 = vpack.c.bf16 %v584_v24, %v580_v25  ;;  %v583_v30 = vsel %vm567_vm7, %v516_v20, %v575_v22  ;;  %v585_v36 = vsel %vm569_vm8, %v559_v21, %v577_v26  ;;  %v771_v12 = vld [vmem:[#allocation5 + $0x5a8] sm:$0xff]  ;;  %v2706_v13 = vcombine.low %v758_v0, %v762_v1  ;;  %v778_v18 = vld [vmem:[#allocation5 + $0x5e0] sm:$0xff] }
 0x3aa   :  { %v3248_v35 = vpack.c.bf16 %v583_v30, %v579_v28  ;;  %v3250_v37 = vpack.c.bf16 %v585_v36, %v581_v34  ;;  %v2715_v15 = vcombine.high %v766_v8, %v770_v9  ;;  %v2717_v16 = vcombine.high %v767_v10, %v771_v12  ;;  %v775_v25 = vld [vmem:[#allocation5 + $0x5c8] sm:$0xff]  ;;  %v782_v24 = vld [vmem:[#allocation5 + $0x600] sm:$0xff] }
 0x3ab   :  { %v779_v19 = vld [vmem:[#allocation5 + $0x5e8] sm:$0xff]  ;;  %v2714_v20 = vcombine.low %v766_v8, %v770_v9  ;;  %v2716_v21 = vcombine.low %v767_v10, %v771_v12  ;;  %v2723_v11 = vcombine.high %v774_v17, %v778_v18  ;;  %v786_v26 = vld [vmem:[#allocation5 + $0x620] sm:$0xff]  ;;  %v2722_v30 = vcombine.low %v774_v17, %v778_v18 }
 0x3ac   :  { %2158 = vmatprep.mubr.bf16.mxu1 %v3248_v35  ;;  %2244 = vmatprep.mubr.bf16.mxu0 %v3248_v35  ;;  %v2725_v22 = vcombine.high %v775_v25, %v779_v19  ;;  %v787_v28 = vld [vmem:[#allocation5 + $0x628] sm:$0xff]  ;;  %v2724_v31 = vcombine.low %v775_v25, %v779_v19  ;;  %v2731_v32 = vcombine.high %v782_v24, %v786_v26  ;;  %v790_v34 = vld [vmem:[#allocation5 + $0x640] sm:$0xff] }
 0x3ad   :  { %2159 = vmatmul.mubr.bf16.vlgmr.msra.gmra.mrb[8].mxu1 %v3244_v23  ;;  %2245 = vmatmul.mubr.bf16.vlgmr.msra.gmra.mrb[8].mxu0 %v3244_v23  ;;  %v2733_v33 = vcombine.high %v783_v27, %v787_v28  ;;  %v794_v36 = vld [vmem:[#allocation5 + $0x660] sm:$0xff]  ;;  %v2732_v41 = vcombine.low %v783_v27, %v787_v28 }
 0x3ae   :  { %2170 = vmatpush1.bf16.msra.mxu1 %v2666_v3  ;;  %2256 = vmatpush1.bf16.msra.mxu0 %v2668_v4  ;;  %v763_v3 = vld [vmem:[#allocation5 + $0x568] sm:$0xff]  ;;  %v2698_v4 = vcombine.low %v750_v56, %v754_v57  ;;  %v2739_v42 = vcombine.high %v790_v34, %v794_v36  ;;  %v2738_v48 = vcombine.low %v790_v34, %v794_v36 }
 0x3af   :  { %2201 = vmatprep.mubr.bf16.mxu1 %v3250_v37  ;;  %2287 = vmatprep.mubr.bf16.mxu0 %v3250_v37  ;;  %v2709_v7 = vcombine.high %v759_v2, %v763_v3  ;;  %v2708_v14 = vcombine.low %v759_v2, %v763_v3 }
 0x3b0   :  { %2171 = vmatprep.subr.bf16.mxu1 %v2675_v39  ;;  %2257 = vmatprep.subr.bf16.mxu0 %v2677_v40  ;;  %v795_v39 = vld [vmem:[#allocation5 + $0x668] sm:$0xff]  ;;  %v2730_v40 = vcombine.low %v782_v24, %v786_v26 }
 0x3b1   :  { %v2741_v43 = vcombine.high %v791_v38, %v795_v39  ;;  %v2740_v49 = vcombine.low %v791_v38, %v795_v39 }
 0x3b2   :  { %2172 = vmatpush1.bf16.msra.mxu1 %v2674_v44  ;;  %2258 = vmatpush1.bf16.msra.mxu0 %v2676_v45  ;;  %v798_v44 = vld [vmem:[#allocation5 + $0x680] sm:$0xff] }
 0x3b3   :  { %2173 = vmatprep.subr.bf16.mxu1 %v2683_v46  ;;  %2259 = vmatprep.subr.bf16.mxu0 %v2685_v47  ;;  %v802_v45 = vld [vmem:[#allocation5 + $0x6a0] sm:$0xff]  ;;  %v799_v46 = vld [vmem:[#allocation5 + $0x688] sm:$0xff] }
 0x3b4   :  { %v803_v47 = vld [vmem:[#allocation5 + $0x6a8] sm:$0xff]  ;;  %v2747_v50 = vcombine.high %v798_v44, %v802_v45  ;;  %v2746_v56 = vcombine.low %v798_v44, %v802_v45 }
 0x3b5   :  { %v2749_v51 = vcombine.high %v799_v46, %v803_v47  ;;  %v2748_v57 = vcombine.low %v799_v46, %v803_v47 }
 0x3b6   :  { %2174 = vmatpush1.bf16.msra.mxu1 %v2682_v52  ;;  %2260 = vmatpush1.bf16.msra.mxu0 %v2684_v53  ;;  %v806_v52 = vld [vmem:[#allocation5 + $0x6c0] sm:$0xff] }
 0x3b7   :  { %2175 = vmatprep.subr.bf16.mxu1 %v2691_v54  ;;  %2261 = vmatprep.subr.bf16.mxu0 %v2693_v55  ;;  %v810_v53 = vld [vmem:[#allocation5 + $0x6e0] sm:$0xff]  ;;  %v807_v54 = vld [vmem:[#allocation5 + $0x6c8] sm:$0xff] }
 0x3b8   :  { %v811_v55 = vld [vmem:[#allocation5 + $0x6e8] sm:$0xff]  ;;  %v2755_v58 = vcombine.high %v806_v52, %v810_v53  ;;  %v2754_v0 = vcombine.low %v806_v52, %v810_v53 }
 0x3b9   :  { %v2757_v59 = vcombine.high %v807_v54, %v811_v55  ;;  %v2756_v1 = vcombine.low %v807_v54, %v811_v55 }
 0x3ba   :  { %2176 = vmatpush1.bf16.msra.mxu1 %v2690_v60  ;;  %2262 = vmatpush1.bf16.msra.mxu0 %v2692_v61  ;;  %v814_v60 = vld [vmem:[#allocation5 + $0x700] sm:$0xff] }
 0x3bb   :  { %2177 = vmatprep.subr.bf16.mxu1 %v2699_v62  ;;  %2263 = vmatprep.subr.bf16.mxu0 %v2701_v63  ;;  %v818_v61 = vld [vmem:[#allocation5 + $0x720] sm:$0xff]  ;;  %v815_v62 = vld [vmem:[#allocation5 + $0x708] sm:$0xff] }
 0x3bc   :  { %v819_v63 = vld [vmem:[#allocation5 + $0x728] sm:$0xff]  ;;  %v2763_v2 = vcombine.high %v814_v60, %v818_v61  ;;  %v2762_v8 = vcombine.low %v814_v60, %v818_v61 }
 0x3bd   :  { %v2765_v3 = vcombine.high %v815_v62, %v819_v63  ;;  %v2764_v9 = vcombine.low %v815_v62, %v819_v63 }
 0x3be   :  { %2178 = vmatpush1.bf16.msra.mxu1 %v2698_v4  ;;  %2264 = vmatpush1.bf16.msra.mxu0 %v2700_v5  ;;  %v822_v4 = vld [vmem:[#allocation5 + $0x740] sm:$0xff] }
 0x3bf   :  { %2179 = vmatprep.subr.bf16.mxu1 %v2707_v6  ;;  %2265 = vmatprep.subr.bf16.mxu0 %v2709_v7  ;;  %v826_v5 = vld [vmem:[#allocation5 + $0x760] sm:$0xff]  ;;  %v823_v6 = vld [vmem:[#allocation5 + $0x748] sm:$0xff] }
 0x3c0   :  { %v827_v7 = vld [vmem:[#allocation5 + $0x768] sm:$0xff]  ;;  %v2771_v10 = vcombine.high %v822_v4, %v826_v5  ;;  %v2770_v17 = vcombine.low %v822_v4, %v826_v5 }
 0x3c1   :  { %v2773_v12 = vcombine.high %v823_v6, %v827_v7  ;;  %v2772_v18 = vcombine.low %v823_v6, %v827_v7  ;;  %v632_v7 = vld [vmem:[#allocation5 + $0x150] sm:$0xff] }
 0x3c2   :  { %2180 = vmatpush1.bf16.msra.mxu1 %v2706_v13  ;;  %2266 = vmatpush1.bf16.msra.mxu0 %v2708_v14  ;;  %v830_v13 = vld [vmem:[#allocation5 + $0x780] sm:$0xff] }
 0x3c3   :  { %2181 = vmatprep.subr.bf16.mxu1 %v2715_v15  ;;  %2267 = vmatprep.subr.bf16.mxu0 %v2717_v16  ;;  %v834_v14 = vld [vmem:[#allocation5 + $0x7a0] sm:$0xff]  ;;  %v831_v15 = vld [vmem:[#allocation5 + $0x788] sm:$0xff] }
 0x3c4   :  { %v835_v16 = vld [vmem:[#allocation5 + $0x7a8] sm:$0xff]  ;;  %v2779_v25 = vcombine.high %v830_v13, %v834_v14  ;;  %v2778_v24 = vcombine.low %v830_v13, %v834_v14 }
 0x3c5   :  { %v2781_v19 = vcombine.high %v831_v15, %v835_v16  ;;  %v2780_v26 = vcombine.low %v831_v15, %v835_v16  ;;  %v640_v16 = vld [vmem:[#allocation5 + $0x190] sm:$0xff] }
 0x3c6   :  { %2182 = vmatpush1.bf16.msra.mxu1 %v2714_v20  ;;  %2268 = vmatpush1.bf16.msra.mxu0 %v2716_v21  ;;  %v838_v20 = vld [vmem:[#allocation5 + $0x7c0] sm:$0xff] }
 0x3c7   :  { %2183 = vmatprep.subr.bf16.mxu1 %v2723_v11  ;;  %2269 = vmatprep.subr.bf16.mxu0 %v2725_v22  ;;  %v842_v21 = vld [vmem:[#allocation5 + $0x7e0] sm:$0xff]  ;;  %v839_v11 = vld [vmem:[#allocation5 + $0x7c8] sm:$0xff] }
 0x3c8   :  { %v843_v22 = vld [vmem:[#allocation5 + $0x7e8] sm:$0xff]  ;;  %v2787_v27 = vcombine.high %v838_v20, %v842_v21  ;;  %v2786_v34 = vcombine.low %v838_v20, %v842_v21 }
 0x3c9   :  { %v2789_v28 = vcombine.high %v839_v11, %v843_v22  ;;  %v2788_v36 = vcombine.low %v839_v11, %v843_v22  ;;  %v648_v22 = vld [vmem:[#allocation5 + $0x1d0] sm:$0xff] }
 0x3ca   :  { %2184 = vmatpush1.bf16.msra.mxu1 %v2722_v30  ;;  %2270 = vmatpush1.bf16.msra.mxu0 %v2724_v31  ;;  %v592_v30 = vld [vmem:[#allocation5 + $0x10] sm:$0xff] }
 0x3cb   :  { %2185 = vmatprep.subr.bf16.mxu1 %v2731_v32  ;;  %2271 = vmatprep.subr.bf16.mxu0 %v2733_v33  ;;  %v596_v31 = vld [vmem:[#allocation5 + $0x30] sm:$0xff]  ;;  %v593_v32 = vld [vmem:[#allocation5 + $0x18] sm:$0xff] }
 0x3cc   :  { %v597_v33 = vld [vmem:[#allocation5 + $0x38] sm:$0xff]  ;;  %v2543_v38 = vcombine.high %v592_v30, %v596_v31  ;;  %v2542_v44 = vcombine.low %v592_v30, %v596_v31 }
 0x3cd   :  { %v2545_v39 = vcombine.high %v593_v32, %v597_v33  ;;  %v2544_v45 = vcombine.low %v593_v32, %v597_v33  ;;  %v656_v33 = vld [vmem:[#allocation5 + $0x210] sm:$0xff] }
 0x3ce   :  { %2186 = vmatpush1.bf16.msra.mxu1 %v2730_v40  ;;  %2272 = vmatpush1.bf16.msra.mxu0 %v2732_v41  ;;  %v600_v40 = vld [vmem:[#allocation5 + $0x50] sm:$0xff] }
 0x3cf   :  { %2187 = vmatprep.subr.bf16.mxu1 %v2739_v42  ;;  %2273 = vmatprep.subr.bf16.mxu0 %v2741_v43  ;;  %v604_v41 = vld [vmem:[#allocation5 + $0x70] sm:$0xff]  ;;  %v601_v42 = vld [vmem:[#allocation5 + $0x58] sm:$0xff] }
 0x3d0   :  { %v605_v43 = vld [vmem:[#allocation5 + $0x78] sm:$0xff]  ;;  %v2551_v46 = vcombine.high %v600_v40, %v604_v41  ;;  %v2550_v52 = vcombine.low %v600_v40, %v604_v41 }
 0x3d1   :  { %v2553_v47 = vcombine.high %v601_v42, %v605_v43  ;;  %v2552_v53 = vcombine.low %v601_v42, %v605_v43  ;;  %v664_v43 = vld [vmem:[#allocation5 + $0x250] sm:$0xff] }
 0x3d2   :  { %2188 = vmatpush1.bf16.msra.mxu1 %v2738_v48  ;;  %2274 = vmatpush1.bf16.msra.mxu0 %v2740_v49  ;;  %v608_v48 = vld [vmem:[#allocation5 + $0x90] sm:$0xff] }
 0x3d3   :  { %2189 = vmatprep.subr.bf16.mxu1 %v2747_v50  ;;  %2275 = vmatprep.subr.bf16.mxu0 %v2749_v51  ;;  %v612_v49 = vld [vmem:[#allocation5 + $0xb0] sm:$0xff]  ;;  %v609_v50 = vld [vmem:[#allocation5 + $0x98] sm:$0xff] }
 0x3d4   :  { %v613_v51 = vld [vmem:[#allocation5 + $0xb8] sm:$0xff]  ;;  %v2559_v54 = vcombine.high %v608_v48, %v612_v49  ;;  %v2558_v60 = vcombine.low %v608_v48, %v612_v49 }
 0x3d5   :  { %v2561_v55 = vcombine.high %v609_v50, %v613_v51  ;;  %v2560_v61 = vcombine.low %v609_v50, %v613_v51  ;;  %v672_v51 = vld [vmem:[#allocation5 + $0x290] sm:$0xff] }
 0x3d6   :  { %2190 = vmatpush1.bf16.msra.mxu1 %v2746_v56  ;;  %2276 = vmatpush1.bf16.msra.mxu0 %v2748_v57  ;;  %v616_v56 = vld [vmem:[#allocation5 + $0xd0] sm:$0xff] }
 0x3d7   :  { %2191 = vmatprep.subr.bf16.mxu1 %v2755_v58  ;;  %2277 = vmatprep.subr.bf16.mxu0 %v2757_v59  ;;  %v620_v57 = vld [vmem:[#allocation5 + $0xf0] sm:$0xff]  ;;  %v617_v58 = vld [vmem:[#allocation5 + $0xd8] sm:$0xff] }
 0x3d8   :  { %v621_v59 = vld [vmem:[#allocation5 + $0xf8] sm:$0xff]  ;;  %v2567_v62 = vcombine.high %v616_v56, %v620_v57 }
 0x3d9   :  { %v2569_v63 = vcombine.high %v617_v58, %v621_v59  ;;  %v2568_v4 = vcombine.low %v617_v58, %v621_v59  ;;  %v680_v59 = vld [vmem:[#allocation5 + $0x2d0] sm:$0xff] }
 0x3da   :  { %2192 = vmatpush1.bf16.msra.mxu1 %v2754_v0  ;;  %2278 = vmatpush1.bf16.msra.mxu0 %v2756_v1  ;;  %v624_v0 = vld [vmem:[#allocation5 + $0x110] sm:$0xff] }
 0x3db   :  { %2193 = vmatprep.subr.bf16.mxu1 %v2763_v2  ;;  %2279 = vmatprep.subr.bf16.mxu0 %v2765_v3  ;;  %v628_v1 = vld [vmem:[#allocation5 + $0x130] sm:$0xff]  ;;  %v629_v2 = vld [vmem:[#allocation5 + $0x138] sm:$0xff]  ;;  %v2566_v3 = vcombine.low %v616_v56, %v620_v57 }
 0x3dc   :  { %v2575_v5 = vcombine.high %v624_v0, %v628_v1 }
 0x3de   :  { %2194 = vmatpush1.bf16.msra.mxu1 %v2762_v8  ;;  %2280 = vmatpush1.bf16.msra.mxu0 %v2764_v9  ;;  %v636_v8 = vld [vmem:[#allocation5 + $0x170] sm:$0xff]  ;;  %v633_v9 = vld [vmem:[#allocation5 + $0x158] sm:$0xff] }
 0x3df   :  { %2195 = vmatprep.subr.bf16.mxu1 %v2771_v10  ;;  %2281 = vmatprep.subr.bf16.mxu0 %v2773_v12  ;;  %v637_v10 = vld [vmem:[#allocation5 + $0x178] sm:$0xff]  ;;  %v2574_v12 = vcombine.low %v624_v0, %v628_v1  ;;  %v2583_v14 = vcombine.high %v632_v7, %v636_v8 }
 0x3e0   :  { %v2585_v15 = vcombine.high %v633_v9, %v637_v10  ;;  %v2584_v20 = vcombine.low %v633_v9, %v637_v10  ;;  %v696_v10 = vld [vmem:[#allocation5 + $0x350] sm:$0xff] }
 0x3e2   :  { %2196 = vmatpush1.bf16.msra.mxu1 %v2770_v17  ;;  %2282 = vmatpush1.bf16.msra.mxu0 %v2772_v18  ;;  %v644_v17 = vld [vmem:[#allocation5 + $0x1b0] sm:$0xff]  ;;  %v641_v18 = vld [vmem:[#allocation5 + $0x198] sm:$0xff] }
 0x3e3   :  { %2197 = vmatprep.subr.bf16.mxu1 %v2779_v25  ;;  %2283 = vmatprep.subr.bf16.mxu0 %v2781_v19  ;;  %v645_v25 = vld [vmem:[#allocation5 + $0x1b8] sm:$0xff]  ;;  %v2582_v19 = vcombine.low %v632_v7, %v636_v8  ;;  %v2591_v21 = vcombine.high %v640_v16, %v644_v17 }
 0x3e4   :  { %v2593_v11 = vcombine.high %v641_v18, %v645_v25  ;;  %v2592_v30 = vcombine.low %v641_v18, %v645_v25  ;;  %v704_v25 = vld [vmem:[#allocation5 + $0x390] sm:$0xff] }
 0x3e6   :  { %2198 = vmatpush1.bf16.msra.mxu1 %v2778_v24  ;;  %2284 = vmatpush1.bf16.msra.mxu0 %v2780_v26  ;;  %v652_v24 = vld [vmem:[#allocation5 + $0x1f0] sm:$0xff]  ;;  %v649_v26 = vld [vmem:[#allocation5 + $0x1d8] sm:$0xff] }
 0x3e7   :  { %2199 = vmatprep.subr.bf16.mxu1 %v2787_v27  ;;  %2285 = vmatprep.subr.bf16.mxu0 %v2789_v28  ;;  %v653_v27 = vld [vmem:[#allocation5 + $0x1f8] sm:$0xff]  ;;  %v2590_v28 = vcombine.low %v640_v16, %v644_v17  ;;  %v2599_v31 = vcombine.high %v648_v22, %v652_v24 }
 0x3e8   :  { %v2601_v32 = vcombine.high %v649_v26, %v653_v27  ;;  %v2600_v40 = vcombine.low %v649_v26, %v653_v27  ;;  %v712_v27 = vld [vmem:[#allocation5 + $0x3d0] sm:$0xff] }
 0x3ea   :  { %2200 = vmatpush1.bf16.msra.mxu1 %v2786_v34  ;;  %2286 = vmatpush1.bf16.msra.mxu0 %v2788_v36  ;;  %v660_v34 = vld [vmem:[#allocation5 + $0x230] sm:$0xff]  ;;  %v657_v36 = vld [vmem:[#allocation5 + $0x218] sm:$0xff] }
 0x3eb   :  { %2298 = vmatprep.subr.bf16.mxu1 %v2543_v38  ;;  %2384 = vmatprep.subr.bf16.mxu0 %v2545_v39  ;;  %v661_v38 = vld [vmem:[#allocation5 + $0x238] sm:$0xff]  ;;  %v2598_v39 = vcombine.low %v648_v22, %v652_v24  ;;  %v2607_v41 = vcombine.high %v656_v33, %v660_v34 }
 0x3ec   :  { %v2609_v42 = vcombine.high %v657_v36, %v661_v38  ;;  %v2608_v48 = vcombine.low %v657_v36, %v661_v38  ;;  %v720_v38 = vld [vmem:[#allocation5 + $0x410] sm:$0xff] }
 0x3ed   :  { %2202 = vmatmul.mubr.bf16.vlgmr.msra.gmra.mrb[8].mxu1 %v3246_v29  ;;  %2288 = vmatmul.mubr.bf16.vlgmr.msra.gmra.mrb[8].mxu0 %v3246_v29 }
 0x3ee   :  { %2299 = vmatpush1.bf16.msra.mxu1 %v2542_v44  ;;  %2330 = vmatprep.mubr.bf16.mxu1 %v3248_v35  ;;  %v668_v44 = vld [vmem:[#allocation5 + $0x270] sm:$0xff] }
 0x3ef   :  { %2385 = vmatpush1.bf16.msra.mxu0 %v2544_v45  ;;  %2416 = vmatprep.mubr.bf16.mxu0 %v3248_v35  ;;  %v625_v35 = vld [vmem:[#allocation5 + $0x118] sm:$0xff]  ;;  %v2615_v49 = vcombine.high %v664_v43, %v668_v44 }
 0x3f0   :  { %2300 = vmatprep.subr.bf16.mxu1 %v2551_v46  ;;  %2386 = vmatprep.subr.bf16.mxu0 %v2553_v47  ;;  %v2577_v6 = vcombine.high %v625_v35, %v629_v2  ;;  %v2576_v13 = vcombine.low %v625_v35, %v629_v2  ;;  %v665_v45 = vld [vmem:[#allocation5 + $0x258] sm:$0xff]  ;;  %v2606_v47 = vcombine.low %v656_v33, %v660_v34  ;;  %v688_v2 = vld [vmem:[#allocation5 + $0x310] sm:$0xff] }
 0x3f1   :  { %v669_v46 = vld [vmem:[#allocation5 + $0x278] sm:$0xff] }
 0x3f2   :  { %2301 = vmatpush1.bf16.msra.mxu1 %v2550_v52  ;;  %v2617_v50 = vcombine.high %v665_v45, %v669_v46  ;;  %v676_v52 = vld [vmem:[#allocation5 + $0x2b0] sm:$0xff]  ;;  %v2616_v56 = vcombine.low %v665_v45, %v669_v46 }
 0x3f3   :  { %2387 = vmatpush1.bf16.msra.mxu0 %v2552_v53  ;;  %2302 = vmatprep.subr.bf16.mxu1 %v2559_v54  ;;  %v673_v53 = vld [vmem:[#allocation5 + $0x298] sm:$0xff]  ;;  %v2623_v57 = vcombine.high %v672_v51, %v676_v52  ;;  %v728_v46 = vld [vmem:[#allocation5 + $0x450] sm:$0xff] }
 0x3f4   :  { %2388 = vmatprep.subr.bf16.mxu0 %v2561_v55  ;;  %v677_v54 = vld [vmem:[#allocation5 + $0x2b8] sm:$0xff]  ;;  %v2614_v55 = vcombine.low %v664_v43, %v668_v44 }
 0x3f5   :  { %v2625_v58 = vcombine.high %v673_v53, %v677_v54  ;;  %v2624_v0 = vcombine.low %v673_v53, %v677_v54  ;;  %v736_v53 = vld [vmem:[#allocation5 + $0x490] sm:$0xff] }
 0x3f6   :  { %2303 = vmatpush1.bf16.msra.mxu1 %v2558_v60  ;;  %v684_v60 = vld [vmem:[#allocation5 + $0x2f0] sm:$0xff] }
 0x3f7   :  { %2389 = vmatpush1.bf16.msra.mxu0 %v2560_v61  ;;  %2304 = vmatprep.subr.bf16.mxu1 %v2567_v62  ;;  %v681_v61 = vld [vmem:[#allocation5 + $0x2d8] sm:$0xff]  ;;  %v2631_v1 = vcombine.high %v680_v59, %v684_v60  ;;  %v740_v54 = vld [vmem:[#allocation5 + $0x4b0] sm:$0xff] }
 0x3f8   :  { %2390 = vmatprep.subr.bf16.mxu0 %v2569_v63  ;;  %v685_v62 = vld [vmem:[#allocation5 + $0x2f8] sm:$0xff]  ;;  %v2622_v63 = vcombine.low %v672_v51, %v676_v52 }
 0x3f9   :  { %v2633_v35 = vcombine.high %v681_v61, %v685_v62  ;;  %v2632_v7 = vcombine.low %v681_v61, %v685_v62  ;;  %v744_v62 = vld [vmem:[#allocation5 + $0x4d0] sm:$0xff] }
 0x3fa   :  { %2305 = vmatpush1.bf16.msra.mxu1 %v2566_v3  ;;  %v692_v3 = vld [vmem:[#allocation5 + $0x330] sm:$0xff] }
 0x3fb   :  { %2391 = vmatpush1.bf16.msra.mxu0 %v2568_v4  ;;  %2306 = vmatprep.subr.bf16.mxu1 %v2575_v5  ;;  %v689_v4 = vld [vmem:[#allocation5 + $0x318] sm:$0xff]  ;;  %v2639_v8 = vcombine.high %v688_v2, %v692_v3 }
 0x3fc   :  { %2392 = vmatprep.subr.bf16.mxu0 %v2577_v6  ;;  %v693_v5 = vld [vmem:[#allocation5 + $0x338] sm:$0xff]  ;;  %v2630_v6 = vcombine.low %v680_v59, %v684_v60  ;;  %v2687_v60 = vcombine.high %v736_v53, %v740_v54 }
 0x3fd   :  { %v2641_v9 = vcombine.high %v689_v4, %v693_v5  ;;  %v2640_v16 = vcombine.low %v689_v4, %v693_v5  ;;  %v752_v4 = vld [vmem:[#allocation5 + $0x510] sm:$0xff] }
 0x3fe   :  { %2307 = vmatpush1.bf16.msra.mxu1 %v2574_v12  ;;  %v700_v12 = vld [vmem:[#allocation5 + $0x370] sm:$0xff] }
 0x3ff   :  { %2393 = vmatpush1.bf16.msra.mxu0 %v2576_v13  ;;  %2308 = vmatprep.subr.bf16.mxu1 %v2583_v14  ;;  %v697_v13 = vld [vmem:[#allocation5 + $0x358] sm:$0xff]  ;;  %v2647_v17 = vcombine.high %v696_v10, %v700_v12  ;;  %v756_v5 = vld [vmem:[#allocation5 + $0x530] sm:$0xff] }
 0x400   :  { %2394 = vmatprep.subr.bf16.mxu0 %v2585_v15  ;;  %v701_v14 = vld [vmem:[#allocation5 + $0x378] sm:$0xff]  ;;  %v2638_v15 = vcombine.low %v688_v2, %v692_v3 }
 0x401   :  { %v2649_v18 = vcombine.high %v697_v13, %v701_v14  ;;  %v2648_v22 = vcombine.low %v697_v13, %v701_v14  ;;  %v764_v13 = vld [vmem:[#allocation5 + $0x570] sm:$0xff]  ;;  %v761_v14 = vld [vmem:[#allocation5 + $0x558] sm:$0xff] }
 0x402   :  { %2309 = vmatpush1.bf16.msra.mxu1 %v2582_v19  ;;  %v708_v19 = vld [vmem:[#allocation5 + $0x3b0] sm:$0xff] }
 0x403   :  { %2395 = vmatpush1.bf16.msra.mxu0 %v2584_v20  ;;  %2310 = vmatprep.subr.bf16.mxu1 %v2591_v21  ;;  %v705_v20 = vld [vmem:[#allocation5 + $0x398] sm:$0xff]  ;;  %v2655_v24 = vcombine.high %v704_v25, %v708_v19 }
 0x404   :  { %2396 = vmatprep.subr.bf16.mxu0 %v2593_v11  ;;  %v709_v21 = vld [vmem:[#allocation5 + $0x3b8] sm:$0xff]  ;;  %v2646_v11 = vcombine.low %v696_v10, %v700_v12  ;;  %v760_v12 = vld [vmem:[#allocation5 + $0x550] sm:$0xff] }
 0x405   :  { %v2657_v26 = vcombine.high %v705_v20, %v709_v21  ;;  %v2656_v33 = vcombine.low %v705_v20, %v709_v21  ;;  %v772_v20 = vld [vmem:[#allocation5 + $0x5b0] sm:$0xff]  ;;  %v769_v21 = vld [vmem:[#allocation5 + $0x598] sm:$0xff] }
 0x406   :  { %2311 = vmatpush1.bf16.msra.mxu1 %v2590_v28  ;;  %v716_v28 = vld [vmem:[#allocation5 + $0x3f0] sm:$0xff] }
 0x407   :  { %2397 = vmatpush1.bf16.msra.mxu0 %v2592_v30  ;;  %2312 = vmatprep.subr.bf16.mxu1 %v2599_v31  ;;  %v713_v30 = vld [vmem:[#allocation5 + $0x3d8] sm:$0xff]  ;;  %v2663_v34 = vcombine.high %v712_v27, %v716_v28 }
 0x408   :  { %2398 = vmatprep.subr.bf16.mxu0 %v2601_v32  ;;  %v717_v31 = vld [vmem:[#allocation5 + $0x3f8] sm:$0xff]  ;;  %v2654_v32 = vcombine.low %v704_v25, %v708_v19  ;;  %v768_v19 = vld [vmem:[#allocation5 + $0x590] sm:$0xff] }
 0x409   :  { %v2665_v36 = vcombine.high %v713_v30, %v717_v31  ;;  %v2664_v43 = vcombine.low %v713_v30, %v717_v31  ;;  %v780_v30 = vld [vmem:[#allocation5 + $0x5f0] sm:$0xff]  ;;  %v777_v31 = vld [vmem:[#allocation5 + $0x5d8] sm:$0xff] }
 0x40a   :  { %2313 = vmatpush1.bf16.msra.mxu1 %v2598_v39  ;;  %v724_v39 = vld [vmem:[#allocation5 + $0x430] sm:$0xff] }
 0x40b   :  { %2399 = vmatpush1.bf16.msra.mxu0 %v2600_v40  ;;  %2314 = vmatprep.subr.bf16.mxu1 %v2607_v41  ;;  %v721_v40 = vld [vmem:[#allocation5 + $0x418] sm:$0xff]  ;;  %v2671_v44 = vcombine.high %v720_v38, %v724_v39 }
 0x40c   :  { %2400 = vmatprep.subr.bf16.mxu0 %v2609_v42  ;;  %v725_v41 = vld [vmem:[#allocation5 + $0x438] sm:$0xff]  ;;  %v2662_v42 = vcombine.low %v712_v27, %v716_v28  ;;  %v776_v28 = vld [vmem:[#allocation5 + $0x5d0] sm:$0xff] }
 0x40d   :  { %v2673_v45 = vcombine.high %v721_v40, %v725_v41  ;;  %v2672_v51 = vcombine.low %v721_v40, %v725_v41  ;;  %v788_v40 = vld [vmem:[#allocation5 + $0x630] sm:$0xff]  ;;  %v785_v41 = vld [vmem:[#allocation5 + $0x618] sm:$0xff] }
 0x40e   :  { %2315 = vmatpush1.bf16.msra.mxu1 %v2606_v47  ;;  %v732_v47 = vld [vmem:[#allocation5 + $0x470] sm:$0xff] }
 0x40f   :  { %2401 = vmatpush1.bf16.msra.mxu0 %v2608_v48  ;;  %2316 = vmatprep.subr.bf16.mxu1 %v2615_v49  ;;  %v2670_v48 = vcombine.low %v720_v38, %v724_v39  ;;  %v729_v49 = vld [vmem:[#allocation5 + $0x458] sm:$0xff]  ;;  %v2679_v52 = vcombine.high %v728_v46, %v732_v47  ;;  %v784_v39 = vld [vmem:[#allocation5 + $0x610] sm:$0xff] }
 0x410   :  { %2402 = vmatprep.subr.bf16.mxu0 %v2617_v50  ;;  %v733_v50 = vld [vmem:[#allocation5 + $0x478] sm:$0xff] }
 0x411   :  { %v2680_v59 = vcombine.low %v729_v49, %v733_v50 }
 0x412   :  { %2317 = vmatpush1.bf16.msra.mxu1 %v2614_v55  ;;  %v2681_v55 = vcombine.high %v729_v49, %v733_v50  ;;  %v793_v49 = vld [vmem:[#allocation5 + $0x658] sm:$0xff] }
 0x413   :  { %2403 = vmatpush1.bf16.msra.mxu0 %v2616_v56  ;;  %2318 = vmatprep.subr.bf16.mxu1 %v2623_v57  ;;  %v737_v56 = vld [vmem:[#allocation5 + $0x498] sm:$0xff] }
 0x414   :  { %2404 = vmatprep.subr.bf16.mxu0 %v2625_v58  ;;  %v741_v57 = vld [vmem:[#allocation5 + $0x4b8] sm:$0xff]  ;;  %v2678_v58 = vcombine.low %v728_v46, %v732_v47  ;;  %v792_v47 = vld [vmem:[#allocation5 + $0x650] sm:$0xff] }
 0x415   :  { %v2689_v61 = vcombine.high %v737_v56, %v741_v57  ;;  %v797_v50 = vld [vmem:[#allocation5 + $0x678] sm:$0xff] }
 0x416   :  { %2319 = vmatpush1.bf16.msra.mxu1 %v2622_v63  ;;  %v748_v63 = vld [vmem:[#allocation5 + $0x4f0] sm:$0xff] }
 0x417   :  { %2405 = vmatpush1.bf16.msra.mxu0 %v2624_v0  ;;  %2320 = vmatprep.subr.bf16.mxu1 %v2631_v1  ;;  %v745_v0 = vld [vmem:[#allocation5 + $0x4d8] sm:$0xff]  ;;  %v2695_v2 = vcombine.high %v744_v62, %v748_v63 }
 0x418   :  { %2406 = vmatprep.subr.bf16.mxu0 %v2633_v35  ;;  %v749_v1 = vld [vmem:[#allocation5 + $0x4f8] sm:$0xff]  ;;  %v2686_v35 = vcombine.low %v736_v53, %v740_v54  ;;  %v2745_v54 = vcombine.high %v793_v49, %v797_v50 }
 0x419   :  { %v2697_v3 = vcombine.high %v745_v0, %v749_v1 }
 0x41a   :  { %2321 = vmatpush1.bf16.msra.mxu1 %v2630_v6  ;;  %v753_v6 = vld [vmem:[#allocation5 + $0x518] sm:$0xff] }
 0x41b   :  { %2407 = vmatpush1.bf16.msra.mxu0 %v2632_v7  ;;  %2322 = vmatprep.subr.bf16.mxu1 %v2639_v8  ;;  %v757_v7 = vld [vmem:[#allocation5 + $0x538] sm:$0xff]  ;;  %v2696_v8 = vcombine.low %v745_v0, %v749_v1  ;;  %v812_v0 = vld [vmem:[#allocation5 + $0x6f0] sm:$0xff] }
 0x41c   :  { %2408 = vmatprep.subr.bf16.mxu0 %v2641_v9  ;;  %v2703_v9 = vcombine.high %v752_v4, %v756_v5  ;;  %v2705_v10 = vcombine.high %v753_v6, %v757_v7  ;;  %v809_v1 = vld [vmem:[#allocation5 + $0x6d8] sm:$0xff] }
 0x41e   :  { %2323 = vmatpush1.bf16.msra.mxu1 %v2638_v15  ;;  %v765_v15 = vld [vmem:[#allocation5 + $0x578] sm:$0xff] }
 0x41f   :  { %2409 = vmatpush1.bf16.msra.mxu0 %v2640_v16  ;;  %2324 = vmatprep.subr.bf16.mxu1 %v2647_v17  ;;  %v2702_v16 = vcombine.low %v752_v4, %v756_v5  ;;  %v2704_v17 = vcombine.low %v753_v6, %v757_v7  ;;  %v2713_v25 = vcombine.high %v761_v14, %v765_v15  ;;  %v816_v5 = vld [vmem:[#allocation5 + $0x710] sm:$0xff]  ;;  %v817_v7 = vld [vmem:[#allocation5 + $0x718] sm:$0xff] }
 0x420   :  { %2410 = vmatprep.subr.bf16.mxu0 %v2649_v18  ;;  %v2711_v18 = vcombine.high %v760_v12, %v764_v13  ;;  %v820_v6 = vld [vmem:[#allocation5 + $0x730] sm:$0xff] }
 0x422   :  { %2325 = vmatpush1.bf16.msra.mxu1 %v2646_v11  ;;  %v773_v11 = vld [vmem:[#allocation5 + $0x5b8] sm:$0xff] }
 0x423   :  { %2411 = vmatpush1.bf16.msra.mxu0 %v2648_v22  ;;  %2326 = vmatprep.subr.bf16.mxu1 %v2655_v24  ;;  %v2710_v22 = vcombine.low %v760_v12, %v764_v13  ;;  %v2712_v24 = vcombine.low %v761_v14, %v765_v15  ;;  %v2721_v27 = vcombine.high %v769_v21, %v773_v11  ;;  %v824_v13 = vld [vmem:[#allocation5 + $0x750] sm:$0xff]  ;;  %v825_v15 = vld [vmem:[#allocation5 + $0x758] sm:$0xff] }
 0x424   :  { %2412 = vmatprep.subr.bf16.mxu0 %v2657_v26  ;;  %v2719_v26 = vcombine.high %v768_v19, %v772_v20  ;;  %v828_v14 = vld [vmem:[#allocation5 + $0x770] sm:$0xff] }
 0x426   :  { %2327 = vmatpush1.bf16.msra.mxu1 %v2654_v32  ;;  %v781_v32 = vld [vmem:[#allocation5 + $0x5f8] sm:$0xff] }
 0x427   :  { %2413 = vmatpush1.bf16.msra.mxu0 %v2656_v33  ;;  %2328 = vmatprep.subr.bf16.mxu1 %v2663_v34  ;;  %v2718_v33 = vcombine.low %v768_v19, %v772_v20  ;;  %v2720_v34 = vcombine.low %v769_v21, %v773_v11  ;;  %v2729_v38 = vcombine.high %v777_v31, %v781_v32  ;;  %v832_v20 = vld [vmem:[#allocation5 + $0x790] sm:$0xff]  ;;  %v833_v11 = vld [vmem:[#allocation5 + $0x798] sm:$0xff] }
 0x428   :  { %2414 = vmatprep.subr.bf16.mxu0 %v2665_v36  ;;  %v2727_v36 = vcombine.high %v776_v28, %v780_v30  ;;  %v836_v21 = vld [vmem:[#allocation5 + $0x7b0] sm:$0xff] }
 0x42a   :  { %2329 = vmatpush1.bf16.msra.mxu1 %v2662_v42  ;;  %v789_v42 = vld [vmem:[#allocation5 + $0x638] sm:$0xff] }
 0x42b   :  { %2415 = vmatpush1.bf16.msra.mxu0 %v2664_v43  ;;  %2341 = vmatprep.subr.bf16.mxu1 %v2671_v44  ;;  %v2726_v43 = vcombine.low %v776_v28, %v780_v30  ;;  %v2728_v44 = vcombine.low %v777_v31, %v781_v32  ;;  %v2737_v46 = vcombine.high %v785_v41, %v789_v42  ;;  %v840_v30 = vld [vmem:[#allocation5 + $0x7d0] sm:$0xff]  ;;  %v841_v32 = vld [vmem:[#allocation5 + $0x7d8] sm:$0xff] }
 0x42c   :  { %2427 = vmatprep.subr.bf16.mxu0 %v2673_v45  ;;  %v2735_v45 = vcombine.high %v784_v39, %v788_v40  ;;  %v844_v31 = vld [vmem:[#allocation5 + $0x7f0] sm:$0xff] }
 0x42d   :  { %2331 = vmatmul.mubr.bf16.vlgmr.msra.gmra.mrb[12].mxu1 %v3244_v23 }
 0x42e   :  { %2417 = vmatmul.mubr.bf16.vlgmr.msra.gmra.mrb[12].mxu0 %v3244_v23  ;;  %2342 = vmatpush1.bf16.msra.mxu1 %v2670_v48  ;;  %v2688_v23 = vcombine.low %v737_v56, %v741_v57  ;;  %v796_v48 = vld [vmem:[#allocation5 + $0x670] sm:$0xff]  ;;  %v801_v57 = vld [vmem:[#allocation5 + $0x698] sm:$0xff] }
 0x42f   :  { %2373 = vmatprep.mubr.bf16.mxu1 %v3250_v37  ;;  %2428 = vmatpush1.bf16.msra.mxu0 %v2672_v51  ;;  %v2734_v51 = vcombine.low %v784_v39, %v788_v40  ;;  %v2743_v53 = vcombine.high %v792_v47, %v796_v48  ;;  %v804_v56 = vld [vmem:[#allocation5 + $0x6b0] sm:$0xff]  ;;  %v2790_v40 = vcombine.low %v840_v30, %v844_v31 }
 0x430   :  { %2459 = vmatprep.mubr.bf16.mxu0 %v3250_v37  ;;  %2343 = vmatprep.subr.bf16.mxu1 %v2679_v52  ;;  %v2694_v37 = vcombine.low %v744_v62, %v748_v63  ;;  %v2736_v52 = vcombine.low %v785_v41, %v789_v42  ;;  %v808_v63 = vld [vmem:[#allocation5 + $0x6d0] sm:$0xff] }
 0x431   :  { %2429 = vmatprep.subr.bf16.mxu0 %v2681_v55  ;;  %v800_v55 = vld [vmem:[#allocation5 + $0x690] sm:$0xff] }
 0x432   :  { %2344 = vmatpush1.bf16.msra.mxu1 %v2678_v58  ;;  %v805_v58 = vld [vmem:[#allocation5 + $0x6b8] sm:$0xff] }
 0x433   :  { %2430 = vmatpush1.bf16.msra.mxu0 %v2680_v59  ;;  %2345 = vmatprep.subr.bf16.mxu1 %v2687_v60  ;;  %v2742_v59 = vcombine.low %v792_v47, %v796_v48  ;;  %v2744_v60 = vcombine.low %v793_v49, %v797_v50  ;;  %v2753_v62 = vcombine.high %v801_v57, %v805_v58 }
 0x434   :  { %2431 = vmatprep.subr.bf16.mxu0 %v2689_v61  ;;  %v2751_v61 = vcombine.high %v800_v55, %v804_v56 }
 0x436   :  { %2346 = vmatpush1.bf16.msra.mxu1 %v2686_v35  ;;  %v813_v35 = vld [vmem:[#allocation5 + $0x6f8] sm:$0xff] }
 0x437   :  { %2432 = vmatpush1.bf16.msra.mxu0 %v2688_v23  ;;  %2347 = vmatprep.subr.bf16.mxu1 %v2695_v2  ;;  %v2750_v23 = vcombine.low %v800_v55, %v804_v56  ;;  %v2752_v2 = vcombine.low %v801_v57, %v805_v58  ;;  %v2761_v4 = vcombine.high %v809_v1, %v813_v35 }
 0x438   :  { %2433 = vmatprep.subr.bf16.mxu0 %v2697_v3  ;;  %v2759_v3 = vcombine.high %v808_v63, %v812_v0 }
 0x43a   :  { %2348 = vmatpush1.bf16.msra.mxu1 %v2694_v37  ;;  %v821_v37 = vld [vmem:[#allocation5 + $0x738] sm:$0xff] }
 0x43b   :  { %2434 = vmatpush1.bf16.msra.mxu0 %v2696_v8  ;;  %2349 = vmatprep.subr.bf16.mxu1 %v2703_v9  ;;  %v2758_v8 = vcombine.low %v808_v63, %v812_v0  ;;  %v2760_v9 = vcombine.low %v809_v1, %v813_v35  ;;  %v2769_v12 = vcombine.high %v817_v7, %v821_v37 }
 0x43c   :  { %2435 = vmatprep.subr.bf16.mxu0 %v2705_v10  ;;  %v2767_v10 = vcombine.high %v816_v5, %v820_v6 }
 0x43e   :  { %2350 = vmatpush1.bf16.msra.mxu1 %v2702_v16  ;;  %v829_v16 = vld [vmem:[#allocation5 + $0x778] sm:$0xff] }
 0x43f   :  { %2436 = vmatpush1.bf16.msra.mxu0 %v2704_v17  ;;  %2351 = vmatprep.subr.bf16.mxu1 %v2711_v18  ;;  %v2766_v17 = vcombine.low %v816_v5, %v820_v6  ;;  %v2768_v18 = vcombine.low %v817_v7, %v821_v37  ;;  %v2777_v19 = vcombine.high %v825_v15, %v829_v16 }
 0x440   :  { %2437 = vmatprep.subr.bf16.mxu0 %v2713_v25  ;;  %v2775_v25 = vcombine.high %v824_v13, %v828_v14 }
 0x442   :  { %2352 = vmatpush1.bf16.msra.mxu1 %v2710_v22  ;;  %v837_v22 = vld [vmem:[#allocation5 + $0x7b8] sm:$0xff] }
 0x443   :  { %2438 = vmatpush1.bf16.msra.mxu0 %v2712_v24  ;;  %2353 = vmatprep.subr.bf16.mxu1 %v2719_v26  ;;  %v2774_v24 = vcombine.low %v824_v13, %v828_v14  ;;  %v2776_v26 = vcombine.low %v825_v15, %v829_v16  ;;  %v2785_v28 = vcombine.high %v833_v11, %v837_v22 }
 0x444   :  { %2439 = vmatprep.subr.bf16.mxu0 %v2721_v27  ;;  %v2783_v27 = vcombine.high %v832_v20, %v836_v21 }
 0x446   :  { %2354 = vmatpush1.bf16.msra.mxu1 %v2718_v33  ;;  %v845_v33 = vld [vmem:[#allocation5 + $0x7f8] sm:$0xff] }
 0x447   :  { %2440 = vmatpush1.bf16.msra.mxu0 %v2720_v34  ;;  %2355 = vmatprep.subr.bf16.mxu1 %v2727_v36  ;;  %v2782_v34 = vcombine.low %v832_v20, %v836_v21  ;;  %v2784_v36 = vcombine.low %v833_v11, %v837_v22  ;;  %v2793_v39 = vcombine.high %v841_v32, %v845_v33 }
 0x448   :  { %2441 = vmatprep.subr.bf16.mxu0 %v2729_v38  ;;  %v2791_v38 = vcombine.high %v840_v30, %v844_v31  ;;  %v2792_v41 = vcombine.low %v841_v32, %v845_v33 }
 0x44a   :  { %2356 = vmatpush1.bf16.msra.mxu1 %v2726_v43 }
 0x44b   :  { %2442 = vmatpush1.bf16.msra.mxu0 %v2728_v44  ;;  %2357 = vmatprep.subr.bf16.mxu1 %v2735_v45 }
 0x44c   :  { %2443 = vmatprep.subr.bf16.mxu0 %v2737_v46 }
 0x44e   :  { %2358 = vmatpush1.bf16.msra.mxu1 %v2734_v51 }
 0x44f   :  { %2444 = vmatpush1.bf16.msra.mxu0 %v2736_v52  ;;  %2359 = vmatprep.subr.bf16.mxu1 %v2743_v53 }
 0x450   :  { %2445 = vmatprep.subr.bf16.mxu0 %v2745_v54 }
 0x452   :  { %2360 = vmatpush1.bf16.msra.mxu1 %v2742_v59 }
 0x453   :  { %2446 = vmatpush1.bf16.msra.mxu0 %v2744_v60  ;;  %2361 = vmatprep.subr.bf16.mxu1 %v2751_v61 }
 0x454   :  { %2447 = vmatprep.subr.bf16.mxu0 %v2753_v62 }
 0x456   :  { %2362 = vmatpush1.bf16.msra.mxu1 %v2750_v23 }
 0x457   :  { %2448 = vmatpush1.bf16.msra.mxu0 %v2752_v2  ;;  %2363 = vmatprep.subr.bf16.mxu1 %v2759_v3 }
 0x458   :  { %2449 = vmatprep.subr.bf16.mxu0 %v2761_v4 }
 0x45a   :  { %2364 = vmatpush1.bf16.msra.mxu1 %v2758_v8 }
 0x45b   :  { %2450 = vmatpush1.bf16.msra.mxu0 %v2760_v9  ;;  %2365 = vmatprep.subr.bf16.mxu1 %v2767_v10 }
 0x45c   :  { %2451 = vmatprep.subr.bf16.mxu0 %v2769_v12 }
 0x45e   :  { %2366 = vmatpush1.bf16.msra.mxu1 %v2766_v17 }
 0x45f   :  { %2452 = vmatpush1.bf16.msra.mxu0 %v2768_v18  ;;  %2367 = vmatprep.subr.bf16.mxu1 %v2775_v25 }
 0x460   :  { %2453 = vmatprep.subr.bf16.mxu0 %v2777_v19 }
 0x462   :  { %2368 = vmatpush1.bf16.msra.mxu1 %v2774_v24 }
 0x463   :  { %2454 = vmatpush1.bf16.msra.mxu0 %v2776_v26  ;;  %2369 = vmatprep.subr.bf16.mxu1 %v2783_v27 }
 0x464   :  { %2455 = vmatprep.subr.bf16.mxu0 %v2785_v28 }
 0x466   :  { %2370 = vmatpush1.bf16.msra.mxu1 %v2782_v34 }
 0x467   :  { %2456 = vmatpush1.bf16.msra.mxu0 %v2784_v36  ;;  %2371 = vmatprep.subr.bf16.mxu1 %v2791_v38 }
 0x468   :  { %2457 = vmatprep.subr.bf16.mxu0 %v2793_v39 }
 0x46a   :  { %2372 = vmatpush1.bf16.msra.mxu1 %v2790_v40 }
 0x46b   :  { %2458 = vmatpush1.bf16.msra.mxu0 %v2792_v41 }
 0x46d   :  { %2374 = vmatmul.mubr.bf16.vlgmr.msra.gmra.mrb[12].mxu1 %v3246_v29 }
 0x46e   :  { %2460 = vmatmul.mubr.bf16.vlgmr.msra.gmra.mrb[12].mxu0 %v3246_v29 }
 0x4c0   :  { %v2203_v42 = vpop.f32.mrb[8].mxu1  ;;  %v2289_v43 = vpop.f32.mrb[8].mxu0 }
 0x4c1   :  { %2470 = vst [vmem:[#allocation7] sm:$0xff] %v2203_v42  ;;  %2472 = vst [vmem:[#allocation7 + $0x10] sm:$0xff] %v2289_v43  ;;  %v2205_v44 = vpop.f32.mrb[9].mxu1  ;;  %v2291_v45 = vpop.f32.mrb[9].mxu0 }
 0x4c2   :  { %2471 = vst [vmem:[#allocation7 + $0x8] sm:$0xff] %v2205_v44  ;;  %2473 = vst [vmem:[#allocation7 + $0x18] sm:$0xff] %v2291_v45  ;;  %v2207_v46 = vpop.f32.mrb[10].mxu1  ;;  %v2293_v47 = vpop.f32.mrb[10].mxu0 }
 0x4c3   :  { %2478 = vst [vmem:[#allocation7 + $0x40] sm:$0xff] %v2207_v46  ;;  %2480 = vst [vmem:[#allocation7 + $0x50] sm:$0xff] %v2293_v47  ;;  %v2209_v48 = vpop.f32.mrb[11].mxu1  ;;  %v2295_v49 = vpop.f32.mrb[11].mxu0 }
 0x4c4   :  { %2479 = vst [vmem:[#allocation7 + $0x48] sm:$0xff] %v2209_v48  ;;  %2481 = vst [vmem:[#allocation7 + $0x58] sm:$0xff] %v2295_v49 }
 0x540   :  { %v2375_v50 = vpop.f32.mrb[12].mxu1 }
 0x541   :  { %2474 = vst [vmem:[#allocation7 + $0x20] sm:$0xff] %v2375_v50  ;;  %v2461_v29 = vpop.f32.mrb[12].mxu0  ;;  %v2377_v51 = vpop.f32.mrb[13].mxu1 }
 0x542   :  { %2476 = vst [vmem:[#allocation7 + $0x30] sm:$0xff] %v2461_v29  ;;  %2475 = vst [vmem:[#allocation7 + $0x28] sm:$0xff] %v2377_v51  ;;  %v2463_v52 = vpop.f32.mrb[13].mxu0  ;;  %v2379_v53 = vpop.f32.mrb[14].mxu1 }
 0x543   :  { %2477 = vst [vmem:[#allocation7 + $0x38] sm:$0xff] %v2463_v52  ;;  %2482 = vst [vmem:[#allocation7 + $0x60] sm:$0xff] %v2379_v53  ;;  %v2465_v54 = vpop.f32.mrb[14].mxu0  ;;  %v2381_v55 = vpop.f32.mrb[15].mxu1 }
 0x544   :  { %2484 = vst [vmem:[#allocation7 + $0x70] sm:$0xff] %v2465_v54  ;;  %2483 = vst [vmem:[#allocation7 + $0x68] sm:$0xff] %v2381_v55  ;;  %v2467_v56 = vpop.f32.mrb[15].mxu0 }
 0x545   :  { %2485 = vst [vmem:[#allocation7 + $0x78] sm:$0xff] %v2467_v56 }
 0x546   :  { %3065 = shalt.err (!%p3062_p6)
}
 0x547   :  { %s3066_s20 = scalar_lea.hbm %s3285_s5, 2048 }
 0x548   :  { %p3067_p7 = scmp.ne.s32.totalorder %s3285_s5, %s3066_s20  ;;  %p3070_p8 = scmp.lt.u32.totalorder %s3066_s20, %s3285_s5 }
 0x54a   :  { %p3072_p9 = pnand %p3070_p8, %p3067_p7 }
 0x54c   :  { %3075 = shalt.err (!%p3072_p9)
}
 0x54d   :  { %s3090_s25 = smov 1024   ;;  %s3091_s26 = smov 64  }
 0x54e   :  { %2497 = dma.vmem_to_hbm [thread:$0]  %s2492_s3, 2048, %s3285_s5, [#allocation4], %s3090_s25, %s3090_s25, %s3091_s26  }
 0x54f   :  { %3080 = dma.done.wait [#allocation4], 2048  }
 0x550   :  { %3081 = vsyncadd [#allocation4], 4294965248 }
 0x551   :  { %2501 = vsyncpa [#allocation3], 1 }
 0x552   :  { %2502 = vsyncpa [#allocation6], 1 }
 0x553   :  { %2503 = vsyncpa [#allocation4], 1 }

</bundles_post_ra>
